<compile_context>
chip_gen: v6e
topology: v6e:2x2x1
jax: 0.10.0
libtpu: 0.0.40
codegen_flags: <defaults>
</compile_context>

<pallas_src>
import functools

import jax
import jax.numpy as jnp
from jax.experimental import pallas as pl
from jax.experimental.pallas import tpu as pltpu

LANE = 128
EPS = 1e-5          # BatchNorm eps (PyTorch default)


def round_up(v, m):
    return (v + m - 1) // m * m


def pad_channels(c):
    """Keep 64-wide channels unpadded (full-dim blocks are legal; padding to 128
    would double MXU/HBM work for conv1/conv2); otherwise round up to 128."""
    if c % LANE == 0 or c == 64:
        return c
    return round_up(c, LANE)


def pick_group(n, k, cap_bytes=4 << 20):
    """Neighbor slots gathered per MXU call; the (g*N, N) bf16 one-hot is capped
    so the edge kernel stays inside v5e's 16 MiB scoped-VMEM default."""
    per_slot = max(1, 2 * n * n)      # bf16 bytes of one (N, N) one-hot
    return int(max(1, min(k, cap_bytes // per_slot)))


# ----------------------------- Pallas kernels ------------------------------ #

def edgeconv_kernel(idx_ref, x_ref, w_ref, bias_ref, out_ref, *, n, k, cp, g):
    """Fused EdgeConv layer for one batch element.

    idx_ref : (1, k*n, 1) int32 kNN indices, neighbor-slot-major.
    x_ref   : (1, n, cin) previous activation (f32 for layer 1, bf16 after).
    w_ref   : (cin, 2*cp) bf16 folded weight [Wn | Wc] (BN scale folded in).
    bias_ref: (1, cp) f32 BN bias.
    out_ref : (1, n, cp) bf16 = lrelu(max_j Wn@x_j + (Wc-Wd)@x_i + b).
    """
    x = x_ref[0].astype(jnp.bfloat16)                                # (n, cin)
    y = jnp.dot(x, w_ref[...], preferred_element_type=jnp.float32)   # (n, 2cp) f32
    yn = y[:, :cp].astype(jnp.bfloat16)      # neighbor term (indexed by j)
    yc = y[:, cp:]                           # center term (stays f32)
    idxc = idx_ref[0]                        # (k*n, 1) int32

    gmax = None
    # Gather g neighbor slots per MXU call: one (g*n, n) bf16 one-hot matmul
    # amortizes MXU push/drain vs g tiny matmuls; f32 accumulation keeps the
    # row selection exact.  Group count is small, so a static loop is fine
    # (switch to lax.fori_loop if k/g ever grows large).
    for j0 in range(0, k, g):
        gs = min(g, k - j0)
        ids = idxc[j0 * n:(j0 + gs) * n, :]                              # (gs*n, 1)
        iota = jax.lax.broadcasted_iota(jnp.int32, (gs * n, n), 1)
        onehot = (ids == iota).astype(jnp.bfloat16)                      # (gs*n, n)
        sel = jnp.dot(onehot, yn, preferred_element_type=jnp.float32)    # (gs*n, cp)
        for s in range(gs):
            blk = sel[s * n:(s + 1) * n, :]
            gmax = blk if gmax is None else jnp.maximum(gmax, blk)

    # LeakyReLU is monotone: max_j lrelu(c + g_j) == lrelu(c + max_j g_j).
    h = gmax + yc + bias_ref[...]
    out_ref[0] = jnp.where(h >= 0.0, h, 0.2 * h).astype(out_ref.dtype)


def conv5_pool_kernel(x1_ref, x2_ref, x3_ref, x4_ref,
                      wa_ref, wb_ref, wc_ref, wd_ref, bias_ref,
                      omax_ref, oavg_ref):
    """conv5 (1x1 Conv1d) for one batch element with the [x1,x2,x3,x4] concat
    fused as four partial bf16 matmuls + BN (scale folded, bias explicit) +
    LeakyReLU + global max/avg pooling over the N points."""
    y = jnp.dot(x1_ref[0], wa_ref[...], preferred_element_type=jnp.float32)
    y = y + jnp.dot(x2_ref[0], wb_ref[...], preferred_element_type=jnp.float32)
    y = y + jnp.dot(x3_ref[0], wc_ref[...], preferred_element_type=jnp.float32)
    y = y + jnp.dot(x4_ref[0], wd_ref[...], preferred_element_type=jnp.float32)
    y = y + bias_ref[...]
    y = jnp.where(y >= 0.0, y, 0.2 * y)
    omax_ref[0] = jnp.max(y, axis=0, keepdims=True)
    oavg_ref[0] = jnp.mean(y, axis=0, keepdims=True)


def head_kernel(x_ref, w1_ref, b1_ref, w2_ref, b2_ref, w3_ref, b3_ref, out_ref):
    """MLP head: lin1->bn6->lrelu->(dropout)->lin2->bn7->lrelu->(dropout)->lin3.
    BN scales folded into bf16 weights; dropout is identity in eval mode.
    Batch rows padded to a sublane multiple, logits padded to 128 lanes."""
    h = jnp.dot(x_ref[...].astype(jnp.bfloat16), w1_ref[...],
                preferred_element_type=jnp.float32) + b1_ref[...]
    h = jnp.where(h >= 0.0, h, 0.2 * h)
    h = jnp.dot(h.astype(jnp.bfloat16), w2_ref[...],
                preferred_element_type=jnp.float32) + b2_ref[...]
    h = jnp.where(h >= 0.0, h, 0.2 * h)
    out_ref[...] = jnp.dot(h.astype(jnp.bfloat16), w3_ref[...],
                           preferred_element_type=jnp.float32) + b3_ref[...]


# ------------------------------ JAX glue ----------------------------------- #

def knn_indices(x, k):
    """Same semantics as DGCNN knn(): idx = top_k(-||x_i - x_j||^2, k) over j."""
    # TODO(synk): top-k neighbor selection has no clean Mosaic lowering; computed
    # in plain JAX.  Only the (B, N, k) int32 indices feed the Pallas kernels.
    x = x.astype(jnp.float32)
    inner = jnp.einsum('bnc,bmc->bnm', x, x)
    sq = jnp.sum(x * x, axis=-1)
    neg_dist = 2.0 * inner - sq[:, :, None] - sq[:, None, :]
    _, idx = jax.lax.top_k(neg_dist, k)
    return idx.astype(jnp.int32)


def bn_scale_bias(p, eps=EPS):
    scale = p['gamma'] / jnp.sqrt(p['var'] + eps)
    bias = p['beta'] - p['mean'] * scale
    return scale, bias


def fold_edge_weights(conv_w, bn_p, cin_store):
    """conv_w: (Cout, 2*Cin) PyTorch conv weight (channel order [x_j - x_i, x_i]).
    Returns a (cin_store, 2*Cp) bf16 combined weight [Wn | Wc] with the BN scale
    folded in, the (1, Cp) f32 BN bias, and Cp."""
    cout, two_cin = conv_w.shape
    cin = two_cin // 2
    cp = pad_channels(cout)
    scale, bias = bn_scale_bias(bn_p)
    wd = conv_w[:, :cin]                              # applied to (x_j - x_i)
    wc = conv_w[:, cin:]                              # applied to x_i
    wn_eff = wd.T * scale[None, :]                    # neighbor term (indexed by j)
    wc_eff = (wc - wd).T * scale[None, :]             # center   term (indexed by i)
    w = jnp.zeros((cin_store, 2 * cp), jnp.float32)
    w = w.at[:cin, :cout].set(wn_eff)
    w = w.at[:cin, cp:cp + cout].set(wc_eff)
    b = jnp.zeros((1, cp), jnp.float32).at[0, :cout].set(bias)
    return w.astype(jnp.bfloat16), b, cp


def fold_conv5(conv5_w, bn_p, widths_real, widths_store):
    """Split conv5_w (emb, 512) into per-input-tensor row blocks (concat fusion),
    fold the BN scale, pad rows/cols to the stored/padded widths, cast bf16."""
    emb = conv5_w.shape[0]
    embp = pad_channels(emb)
    scale, bias = bn_scale_bias(bn_p)
    ws, off = [], 0
    for cr, cs in zip(widths_real, widths_store):
        wt = conv5_w[:, off:off + cr].T * scale[None, :]       # (cr, emb)
        wp = jnp.zeros((cs, embp), jnp.float32).at[:cr, :emb].set(wt)
        ws.append(wp.astype(jnp.bfloat16))
        off += cr
    b = jnp.zeros((1, embp), jnp.float32).at[0, :emb].set(bias)
    return ws, b, embp


def edge_conv(x_bnc, idx_col, w_comb, bias, n, k, cp):
    b, _, cin_s = x_bnc.shape
    g = pick_group(n, k)
    return pl.pallas_call(
        functools.partial(edgeconv_kernel, n=n, k=k, cp=cp, g=g),
        out_shape=jax.ShapeDtypeStruct((b, n, cp), jnp.bfloat16),
        grid=(b,),
        in_specs=[pl.BlockSpec((1, k * n, 1), lambda i: (i, 0, 0)),
                  pl.BlockSpec((1, n, cin_s), lambda i: (i, 0, 0)),
                  pl.BlockSpec((cin_s, 2 * cp), lambda i: (0, 0)),
                  pl.BlockSpec((1, cp), lambda i: (0, 0))],
        out_specs=pl.BlockSpec((1, n, cp), lambda i: (i, 0, 0)),
        compiler_params=pltpu.CompilerParams(dimension_semantics=("parallel",)),
    )(idx_col, x_bnc, w_comb, bias)


def dgcnn_forward(x, params, k=4):
    """x: (B, N, C) channels-last point cloud.  Returns (B, num_class) f32 logits."""
    B, N, _ = x.shape

    # ---- EdgeConv stack (conv1..conv4): one fused per-batch kernel per layer ----
    feats = []
    cur = x                                                        # (B, N, C)
    for wname, bnname in (('conv1_w', 'bn1'), ('conv2_w', 'bn2'),
                          ('conv3_w', 'bn3'), ('conv4_w', 'bn4')):
        idx = knn_indices(cur, k)                                  # (B, N, k) int32
        idx_col = jnp.transpose(idx, (0, 2, 1)).reshape(B, k * N, 1)
        w_comb, bias, cp = fold_edge_weights(params[wname], params[bnname],
                                             cur.shape[2])
        cur = edge_conv(cur, idx_col, w_comb, bias, N, k, cp)      # (B, N, cp) bf16
        feats.append(cur)
    x1f, x2f, x3f, x4f = feats

    # ---- conv5 + global max/avg pooling; [x1,x2,x3,x4] concat fused in-kernel ----
    emb = params['conv5_w'].shape[0]
    widths_real = tuple(params[w].shape[0] for w in
                        ('conv1_w', 'conv2_w', 'conv3_w', 'conv4_w'))
    widths_store = tuple(f.shape[2] for f in feats)
    (wa, wb, wc5, wd5), b5, embp = fold_conv5(params['conv5_w'], params['bn5'],
                                              widths_real, widths_store)
    mx, av = pl.pallas_call(
        conv5_pool_kernel,
        out_shape=(jax.ShapeDtypeStruct((B, 1, embp), jnp.float32),
                   jax.ShapeDtypeStruct((B, 1, embp), jnp.float32)),
        grid=(B,),
        in_specs=[
            pl.BlockSpec((1, N, widths_store[0]), lambda i: (i, 0, 0)),
            pl.BlockSpec((1, N, widths_store[1]), lambda i: (i, 0, 0)),
            pl.BlockSpec((1, N, widths_store[2]), lambda i: (i, 0, 0)),
            pl.BlockSpec((1, N, widths_store[3]), lambda i: (i, 0, 0)),
            pl.BlockSpec((widths_store[0], embp), lambda i: (0, 0)),
            pl.BlockSpec((widths_store[1], embp), lambda i: (0, 0)),
            pl.BlockSpec((widths_store[2], embp), lambda i: (0, 0)),
            pl.BlockSpec((widths_store[3], embp), lambda i: (0, 0)),
            pl.BlockSpec((1, embp), lambda i: (0, 0)),
        ],
        out_specs=(pl.BlockSpec((1, 1, embp), lambda i: (i, 0, 0)),
                   pl.BlockSpec((1, 1, embp), lambda i: (i, 0, 0))),
        compiler_params=pltpu.CompilerParams(dimension_semantics=("parallel",)),
    )(x1f, x2f, x3f, x4f, wa, wb, wc5, wd5, b5)

    # ---- MLP head (sublane-padded batch, lane-padded logits) ----
    feat = jnp.concatenate([mx.reshape(B, embp)[:, :emb],
                            av.reshape(B, embp)[:, :emb]], axis=1)   # (B, 2*emb)
    fin = 2 * emb
    finp = round_up(fin, LANE)
    bp = max(8, round_up(B, 8))
    feat_p = jnp.zeros((bp, finp), jnp.float32).at[:B, :fin].set(feat)

    s6, bb6 = bn_scale_bias(params['bn6'])
    s7, bb7 = bn_scale_bias(params['bn7'])
    w1 = params['lin1_w'].T * s6[None, :]                            # (2*emb, 512)
    w1p = (jnp.zeros((finp, w1.shape[1]), jnp.float32)
           .at[:fin].set(w1).astype(jnp.bfloat16))
    b1 = bb6.reshape(1, -1)
    w2p = (params['lin2_w'].T * s7[None, :]).astype(jnp.bfloat16)    # (512, 256)
    b2 = (s7 * params['lin2_b'] + bb7).reshape(1, -1)
    num_class = params['lin3_w'].shape[0]
    ncp = round_up(num_class, LANE)
    w3p = (jnp.zeros((params['lin3_w'].shape[1], ncp), jnp.float32)
           .at[:, :num_class].set(params['lin3_w'].T).astype(jnp.bfloat16))
    b3p = jnp.zeros((1, ncp), jnp.float32).at[0, :num_class].set(params['lin3_b'])

    def _full(shape):
        return pl.BlockSpec(shape, lambda i: (0,) * len(shape))

    args = (feat_p, w1p, b1, w2p, b2, w3p, b3p)
    logits_p = pl.pallas_call(
        head_kernel,
        out_shape=jax.ShapeDtypeStruct((bp, ncp), jnp.float32),
        grid=(1,),
        in_specs=[_full(a.shape) for a in args],
        out_specs=_full((bp, ncp)),
        compiler_params=pltpu.CompilerParams(dimension_semantics=("arbitrary",)),
    )(*args)
    return logits_p[:B, :num_class]


# --------------------------- parameter init -------------------------------- #

def init_params(key, emb_dims=64, num_class=40, num_channel=3):
    keys = jax.random.split(key, 40)
    it = iter(keys)

    def w(cout, cin):
        return jax.random.normal(next(it), (cout, cin), jnp.float32) / jnp.sqrt(cin)

    def bn(c):
        return dict(
            gamma=1.0 + 0.1 * jax.random.normal(next(it), (c,), jnp.float32),
            beta=0.1 * jax.random.normal(next(it), (c,), jnp.float32),
            mean=0.1 * jax.random.normal(next(it), (c,), jnp.float32),
            var=0.5 + jax.random.uniform(next(it), (c,), jnp.float32),
        )

    p = {}
    p['conv1_w'] = w(64, num_channel * 2);  p['bn1'] = bn(64)
    p['conv2_w'] = w(64, 64 * 2);           p['bn2'] = bn(64)
    p['conv3_w'] = w(128, 64 * 2);          p['bn3'] = bn(128)
    p['conv4_w'] = w(256, 128 * 2);         p['bn4'] = bn(256)
    p['conv5_w'] = w(emb_dims, 512);        p['bn5'] = bn(emb_dims)
    p['lin1_w'] = w(512, emb_dims * 2);     p['bn6'] = bn(512)
    p['lin2_w'] = w(256, 512)
    p['lin2_b'] = 0.1 * jax.random.normal(next(it), (256,), jnp.float32)
    p['bn7'] = bn(256)
    p['lin3_w'] = w(num_class, 256)
    p['lin3_b'] = 0.1 * jax.random.normal(next(it), (num_class,), jnp.float32)
    return p


# --------------------------------- main ------------------------------------ #

if __name__ == "__main__":
    key = jax.random.PRNGKey(0)
    pkey, xkey = jax.random.split(key)

    B, C, N = 2, 3, 16             # small shapes: batch=2, 3 coords, 16 points
    K, EMB, NUM_CLASS = 4, 64, 40  # args.k=4, args.emb_dims=64

    params = init_params(pkey, emb_dims=EMB, num_class=NUM_CLASS, num_channel=C)

    x_torch_layout = jax.random.normal(xkey, (B, C, N), jnp.float32)  # PyTorch (B, C, N)
    x = jnp.transpose(x_torch_layout, (0, 2, 1))                      # -> (B, N, C)

    fwd = jax.jit(functools.partial(dgcnn_forward, k=K))
    logits = fwd(x, params)
    jax.block_until_ready(logits)
    assert logits.shape == (B, NUM_CLASS) and logits.dtype == jnp.float32
    print("KERNEL_OK")
</pallas_src>

<mosaic_0001>
module attributes {stable_mosaic.version = 11 : i64} {
  func.func @edgeconv_kernel(%arg0: i32, %arg1: memref<1x64x1xi32, #tpu.memory_space<vmem>>, %arg2: memref<1x16x3xf32, #tpu.memory_space<vmem>>, %arg3: memref<3x128xbf16, #tpu.memory_space<vmem>>, %arg4: memref<1x64xf32, #tpu.memory_space<vmem>>, %arg5: memref<1x16x64xbf16, #tpu.memory_space<vmem>>) attributes {dimension_semantics = [#tpu.dimension_semantics<parallel>], iteration_bounds = array<i64: 2>, scalar_prefetch = 0 : i64, scratch_operands = 0 : i64, tpu.core_type = #tpu.core_type<tc>, window_params = [{transform_indices = @transform_0, window_bounds = array<i64: 1, 64, 1>}, {transform_indices = @transform_1, window_bounds = array<i64: 1, 16, 3>}, {pipeline_mode = #tpu.pipeline_mode<synchronous>, transform_indices = @transform_2, window_bounds = array<i64: 3, 128>}, {pipeline_mode = #tpu.pipeline_mode<synchronous>, transform_indices = @transform_3, window_bounds = array<i64: 1, 64>}, {transform_indices = @transform_4, window_bounds = array<i64: 1, 16, 64>}]} {
    %c0 = arith.constant 0 : index
    %c0_0 = arith.constant 0 : index
    %c0_1 = arith.constant 0 : index
    %0 = vector.load %arg2[%c0, %c0_0, %c0_1] : memref<1x16x3xf32, #tpu.memory_space<vmem>>, vector<1x16x3xf32>
    %1 = vector.shape_cast %0 : vector<1x16x3xf32> to vector<16x3xf32>
    %2 = arith.truncf %1 : vector<16x3xf32> to vector<16x3xbf16>
    %c0_2 = arith.constant 0 : index
    %c0_3 = arith.constant 0 : index
    %3 = vector.load %arg3[%c0_2, %c0_3] : memref<3x128xbf16, #tpu.memory_space<vmem>>, vector<3x128xbf16>
    %cst = arith.constant dense<0.000000e+00> : vector<16x128xf32>
    %4 = tpu.matmul %2, %3, %cst {dimension_numbers = #tpu.dot_dimension_numbers<[1], [0], [0], [1], [0, 0, 1, 1], [], []>} : vector<16x3xbf16>, vector<3x128xbf16>, vector<16x128xf32> -> vector<16x128xf32>
    %5 = vector.extract_strided_slice %4 {offsets = [0, 0], sizes = [16, 64], strides = [1, 1]} : vector<16x128xf32> to vector<16x64xf32>
    %6 = arith.truncf %5 : vector<16x64xf32> to vector<16x64xbf16>
    %7 = vector.extract_strided_slice %4 {offsets = [0, 64], sizes = [16, 64], strides = [1, 1]} : vector<16x128xf32> to vector<16x64xf32>
    %c0_4 = arith.constant 0 : index
    %c0_5 = arith.constant 0 : index
    %c0_6 = arith.constant 0 : index
    %8 = vector.load %arg1[%c0_4, %c0_5, %c0_6] : memref<1x64x1xi32, #tpu.memory_space<vmem>>, vector<1x64x1xi32>
    %9 = vector.shape_cast %8 : vector<1x64x1xi32> to vector<64x1xi32>
    %10 = tpu.iota {dimensions = array<i32: 1>} : vector<64x16xi32>
    %11 = vector.broadcast %9 : vector<64x1xi32> to vector<64x16xi32>
    %12 = arith.cmpi eq, %11, %10 : vector<64x16xi32>
    %13 = arith.extui %12 : vector<64x16xi1> to vector<64x16xi32>
    %14 = arith.sitofp %13 : vector<64x16xi32> to vector<64x16xf32>
    %15 = arith.truncf %14 : vector<64x16xf32> to vector<64x16xbf16>
    %cst_7 = arith.constant dense<0.000000e+00> : vector<64x64xf32>
    %16 = tpu.matmul %15, %6, %cst_7 {dimension_numbers = #tpu.dot_dimension_numbers<[1], [0], [0], [1], [0, 0, 1, 1], [], []>} : vector<64x16xbf16>, vector<16x64xbf16>, vector<64x64xf32> -> vector<64x64xf32>
    %17 = vector.extract_strided_slice %16 {offsets = [0, 0], sizes = [16, 64], strides = [1, 1]} : vector<64x64xf32> to vector<16x64xf32>
    %18 = vector.extract_strided_slice %16 {offsets = [16, 0], sizes = [16, 64], strides = [1, 1]} : vector<64x64xf32> to vector<16x64xf32>
    %19 = arith.maximumf %17, %18 : vector<16x64xf32>
    %20 = vector.extract_strided_slice %16 {offsets = [32, 0], sizes = [16, 64], strides = [1, 1]} : vector<64x64xf32> to vector<16x64xf32>
    %21 = arith.maximumf %19, %20 : vector<16x64xf32>
    %22 = vector.extract_strided_slice %16 {offsets = [48, 0], sizes = [16, 64], strides = [1, 1]} : vector<64x64xf32> to vector<16x64xf32>
    %23 = arith.maximumf %21, %22 : vector<16x64xf32>
    %24 = arith.addf %23, %7 : vector<16x64xf32>
    %c0_8 = arith.constant 0 : index
    %c0_9 = arith.constant 0 : index
    %25 = vector.load %arg4[%c0_8, %c0_9] : memref<1x64xf32, #tpu.memory_space<vmem>>, vector<1x64xf32>
    %26 = vector.broadcast %25 : vector<1x64xf32> to vector<16x64xf32>
    %27 = arith.addf %24, %26 : vector<16x64xf32>
    %cst_10 = arith.constant 0.000000e+00 : f32
    %28 = vector.broadcast %cst_10 : f32 to vector<16x64xf32>
    %29 = arith.cmpf oge, %27, %28 : vector<16x64xf32>
    %cst_11 = arith.constant 2.000000e-01 : f32
    %30 = vector.broadcast %cst_11 : f32 to vector<16x64xf32>
    %31 = arith.mulf %30, %27 : vector<16x64xf32>
    %32 = arith.select %29, %27, %31 : vector<16x64xi1>, vector<16x64xf32>
    %33 = arith.truncf %32 : vector<16x64xf32> to vector<16x64xbf16>
    %c0_12 = arith.constant 0 : index
    %c0_13 = arith.constant 0 : index
    %c0_14 = arith.constant 0 : index
    %34 = vector.load %arg5[%c0_12, %c0_13, %c0_14] : memref<1x16x64xbf16, #tpu.memory_space<vmem>>, vector<1x16x64xbf16>
    %35 = vector.shape_cast %34 : vector<1x16x64xbf16> to vector<16x64xbf16>
    %36 = vector.shape_cast %33 : vector<16x64xbf16> to vector<1x16x64xbf16>
    tpu.vector_store %arg5[%c0_12, %c0_13, %c0_14], %36 {strides = array<i32>} : memref<1x16x64xbf16, #tpu.memory_space<vmem>>, vector<1x16x64xbf16>,
    return
  }
  func.func @transform_0(%arg0: i32) -> (i32, i32, i32) {
    %c0_i32 = arith.constant 0 : i32
    %c0_i32_0 = arith.constant 0 : i32
    %c0_i32_1 = arith.constant 0 : i32
    return %arg0, %c0_i32, %c0_i32_0 : i32, i32, i32
  }
  func.func @transform_1(%arg0: i32) -> (i32, i32, i32) {
    %c0_i32 = arith.constant 0 : i32
    %c0_i32_0 = arith.constant 0 : i32
    %c0_i32_1 = arith.constant 0 : i32
    return %arg0, %c0_i32, %c0_i32_0 : i32, i32, i32
  }
  func.func @transform_2(%arg0: i32) -> (i32, i32) {
    %c0_i32 = arith.constant 0 : i32
    %c0_i32_0 = arith.constant 0 : i32
    %c0_i32_1 = arith.constant 0 : i32
    return %c0_i32, %c0_i32_0 : i32, i32
  }
  func.func @transform_3(%arg0: i32) -> (i32, i32) {
    %c0_i32 = arith.constant 0 : i32
    %c0_i32_0 = arith.constant 0 : i32
    %c0_i32_1 = arith.constant 0 : i32
    return %c0_i32, %c0_i32_0 : i32, i32
  }
  func.func @transform_4(%arg0: i32) -> (i32, i32, i32) {
    %c0_i32 = arith.constant 0 : i32
    %c0_i32_0 = arith.constant 0 : i32
    %c0_i32_1 = arith.constant 0 : i32
    return %arg0, %c0_i32, %c0_i32_0 : i32, i32, i32
  }
}

module attributes {stable_mosaic.version = 11 : i64} {
  func.func @edgeconv_kernel(%arg0: i32, %arg1: memref<1x64x1xi32, #tpu.memory_space<vmem>>, %arg2: memref<1x16x64xbf16, #tpu.memory_space<vmem>>, %arg3: memref<64x128xbf16, #tpu.memory_space<vmem>>, %arg4: memref<1x64xf32, #tpu.memory_space<vmem>>, %arg5: memref<1x16x64xbf16, #tpu.memory_space<vmem>>) attributes {dimension_semantics = [#tpu.dimension_semantics<parallel>], iteration_bounds = array<i64: 2>, scalar_prefetch = 0 : i64, scratch_operands = 0 : i64, tpu.core_type = #tpu.core_type<tc>, window_params = [{transform_indices = @transform_0, window_bounds = array<i64: 1, 64, 1>}, {transform_indices = @transform_1, window_bounds = array<i64: 1, 16, 64>}, {pipeline_mode = #tpu.pipeline_mode<synchronous>, transform_indices = @transform_2, window_bounds = array<i64: 64, 128>}, {pipeline_mode = #tpu.pipeline_mode<synchronous>, transform_indices = @transform_3, window_bounds = array<i64: 1, 64>}, {transform_indices = @transform_4, window_bounds = array<i64: 1, 16, 64>}]} {
    %c0 = arith.constant 0 : index
    %c0_0 = arith.constant 0 : index
    %c0_1 = arith.constant 0 : index
    %0 = vector.load %arg2[%c0, %c0_0, %c0_1] : memref<1x16x64xbf16, #tpu.memory_space<vmem>>, vector<1x16x64xbf16>
    %1 = vector.shape_cast %0 : vector<1x16x64xbf16> to vector<16x64xbf16>
    %c0_2 = arith.constant 0 : index
    %c0_3 = arith.constant 0 : index
    %2 = vector.load %arg3[%c0_2, %c0_3] : memref<64x128xbf16, #tpu.memory_space<vmem>>, vector<64x128xbf16>
    %cst = arith.constant dense<0.000000e+00> : vector<16x128xf32>
    %3 = tpu.matmul %1, %2, %cst {dimension_numbers = #tpu.dot_dimension_numbers<[1], [0], [0], [1], [0, 0, 1, 1], [], []>} : vector<16x64xbf16>, vector<64x128xbf16>, vector<16x128xf32> -> vector<16x128xf32>
    %4 = vector.extract_strided_slice %3 {offsets = [0, 0], sizes = [16, 64], strides = [1, 1]} : vector<16x128xf32> to vector<16x64xf32>
    %5 = arith.truncf %4 : vector<16x64xf32> to vector<16x64xbf16>
    %6 = vector.extract_strided_slice %3 {offsets = [0, 64], sizes = [16, 64], strides = [1, 1]} : vector<16x128xf32> to vector<16x64xf32>
    %c0_4 = arith.constant 0 : index
    %c0_5 = arith.constant 0 : index
    %c0_6 = arith.constant 0 : index
    %7 = vector.load %arg1[%c0_4, %c0_5, %c0_6] : memref<1x64x1xi32, #tpu.memory_space<vmem>>, vector<1x64x1xi32>
    %8 = vector.shape_cast %7 : vector<1x64x1xi32> to vector<64x1xi32>
    %9 = tpu.iota {dimensions = array<i32: 1>} : vector<64x16xi32>
    %10 = vector.broadcast %8 : vector<64x1xi32> to vector<64x16xi32>
    %11 = arith.cmpi eq, %10, %9 : vector<64x16xi32>
    %12 = arith.extui %11 : vector<64x16xi1> to vector<64x16xi32>
    %13 = arith.sitofp %12 : vector<64x16xi32> to vector<64x16xf32>
    %14 = arith.truncf %13 : vector<64x16xf32> to vector<64x16xbf16>
    %cst_7 = arith.constant dense<0.000000e+00> : vector<64x64xf32>
    %15 = tpu.matmul %14, %5, %cst_7 {dimension_numbers = #tpu.dot_dimension_numbers<[1], [0], [0], [1], [0, 0, 1, 1], [], []>} : vector<64x16xbf16>, vector<16x64xbf16>, vector<64x64xf32> -> vector<64x64xf32>
    %16 = vector.extract_strided_slice %15 {offsets = [0, 0], sizes = [16, 64], strides = [1, 1]} : vector<64x64xf32> to vector<16x64xf32>
    %17 = vector.extract_strided_slice %15 {offsets = [16, 0], sizes = [16, 64], strides = [1, 1]} : vector<64x64xf32> to vector<16x64xf32>
    %18 = arith.maximumf %16, %17 : vector<16x64xf32>
    %19 = vector.extract_strided_slice %15 {offsets = [32, 0], sizes = [16, 64], strides = [1, 1]} : vector<64x64xf32> to vector<16x64xf32>
    %20 = arith.maximumf %18, %19 : vector<16x64xf32>
    %21 = vector.extract_strided_slice %15 {offsets = [48, 0], sizes = [16, 64], strides = [1, 1]} : vector<64x64xf32> to vector<16x64xf32>
    %22 = arith.maximumf %20, %21 : vector<16x64xf32>
    %23 = arith.addf %22, %6 : vector<16x64xf32>
    %c0_8 = arith.constant 0 : index
    %c0_9 = arith.constant 0 : index
    %24 = vector.load %arg4[%c0_8, %c0_9] : memref<1x64xf32, #tpu.memory_space<vmem>>, vector<1x64xf32>
    %25 = vector.broadcast %24 : vector<1x64xf32> to vector<16x64xf32>
    %26 = arith.addf %23, %25 : vector<16x64xf32>
    %cst_10 = arith.constant 0.000000e+00 : f32
    %27 = vector.broadcast %cst_10 : f32 to vector<16x64xf32>
    %28 = arith.cmpf oge, %26, %27 : vector<16x64xf32>
    %cst_11 = arith.constant 2.000000e-01 : f32
    %29 = vector.broadcast %cst_11 : f32 to vector<16x64xf32>
    %30 = arith.mulf %29, %26 : vector<16x64xf32>
    %31 = arith.select %28, %26, %30 : vector<16x64xi1>, vector<16x64xf32>
    %32 = arith.truncf %31 : vector<16x64xf32> to vector<16x64xbf16>
    %c0_12 = arith.constant 0 : index
    %c0_13 = arith.constant 0 : index
    %c0_14 = arith.constant 0 : index
    %33 = vector.load %arg5[%c0_12, %c0_13, %c0_14] : memref<1x16x64xbf16, #tpu.memory_space<vmem>>, vector<1x16x64xbf16>
    %34 = vector.shape_cast %33 : vector<1x16x64xbf16> to vector<16x64xbf16>
    %35 = vector.shape_cast %32 : vector<16x64xbf16> to vector<1x16x64xbf16>
    tpu.vector_store %arg5[%c0_12, %c0_13, %c0_14], %35 {strides = array<i32>} : memref<1x16x64xbf16, #tpu.memory_space<vmem>>, vector<1x16x64xbf16>,
    return
  }
  func.func @transform_0(%arg0: i32) -> (i32, i32, i32) {
    %c0_i32 = arith.constant 0 : i32
    %c0_i32_0 = arith.constant 0 : i32
    %c0_i32_1 = arith.constant 0 : i32
    return %arg0, %c0_i32, %c0_i32_0 : i32, i32, i32
  }
  func.func @transform_1(%arg0: i32) -> (i32, i32, i32) {
    %c0_i32 = arith.constant 0 : i32
    %c0_i32_0 = arith.constant 0 : i32
    %c0_i32_1 = arith.constant 0 : i32
    return %arg0, %c0_i32, %c0_i32_0 : i32, i32, i32
  }
  func.func @transform_2(%arg0: i32) -> (i32, i32) {
    %c0_i32 = arith.constant 0 : i32
    %c0_i32_0 = arith.constant 0 : i32
    %c0_i32_1 = arith.constant 0 : i32
    return %c0_i32, %c0_i32_0 : i32, i32
  }
  func.func @transform_3(%arg0: i32) -> (i32, i32) {
    %c0_i32 = arith.constant 0 : i32
    %c0_i32_0 = arith.constant 0 : i32
    %c0_i32_1 = arith.constant 0 : i32
    return %c0_i32, %c0_i32_0 : i32, i32
  }
  func.func @transform_4(%arg0: i32) -> (i32, i32, i32) {
    %c0_i32 = arith.constant 0 : i32
    %c0_i32_0 = arith.constant 0 : i32
    %c0_i32_1 = arith.constant 0 : i32
    return %arg0, %c0_i32, %c0_i32_0 : i32, i32, i32
  }
}

module attributes {stable_mosaic.version = 11 : i64} {
  func.func @edgeconv_kernel(%arg0: i32, %arg1: memref<1x64x1xi32, #tpu.memory_space<vmem>>, %arg2: memref<1x16x64xbf16, #tpu.memory_space<vmem>>, %arg3: memref<64x256xbf16, #tpu.memory_space<vmem>>, %arg4: memref<1x128xf32, #tpu.memory_space<vmem>>, %arg5: memref<1x16x128xbf16, #tpu.memory_space<vmem>>) attributes {dimension_semantics = [#tpu.dimension_semantics<parallel>], iteration_bounds = array<i64: 2>, scalar_prefetch = 0 : i64, scratch_operands = 0 : i64, tpu.core_type = #tpu.core_type<tc>, window_params = [{transform_indices = @transform_0, window_bounds = array<i64: 1, 64, 1>}, {transform_indices = @transform_1, window_bounds = array<i64: 1, 16, 64>}, {pipeline_mode = #tpu.pipeline_mode<synchronous>, transform_indices = @transform_2, window_bounds = array<i64: 64, 256>}, {pipeline_mode = #tpu.pipeline_mode<synchronous>, transform_indices = @transform_3, window_bounds = array<i64: 1, 128>}, {transform_indices = @transform_4, window_bounds = array<i64: 1, 16, 128>}]} {
    %c0 = arith.constant 0 : index
    %c0_0 = arith.constant 0 : index
    %c0_1 = arith.constant 0 : index
    %0 = vector.load %arg2[%c0, %c0_0, %c0_1] : memref<1x16x64xbf16, #tpu.memory_space<vmem>>, vector<1x16x64xbf16>
    %1 = vector.shape_cast %0 : vector<1x16x64xbf16> to vector<16x64xbf16>
    %c0_2 = arith.constant 0 : index
    %c0_3 = arith.constant 0 : index
    %2 = vector.load %arg3[%c0_2, %c0_3] : memref<64x256xbf16, #tpu.memory_space<vmem>>, vector<64x256xbf16>
    %cst = arith.constant dense<0.000000e+00> : vector<16x256xf32>
    %3 = tpu.matmul %1, %2, %cst {dimension_numbers = #tpu.dot_dimension_numbers<[1], [0], [0], [1], [0, 0, 1, 1], [], []>} : vector<16x64xbf16>, vector<64x256xbf16>, vector<16x256xf32> -> vector<16x256xf32>
    %4 = vector.extract_strided_slice %3 {offsets = [0, 0], sizes = [16, 128], strides = [1, 1]} : vector<16x256xf32> to vector<16x128xf32>
    %5 = arith.truncf %4 : vector<16x128xf32> to vector<16x128xbf16>
    %6 = vector.extract_strided_slice %3 {offsets = [0, 128], sizes = [16, 128], strides = [1, 1]} : vector<16x256xf32> to vector<16x128xf32>
    %c0_4 = arith.constant 0 : index
    %c0_5 = arith.constant 0 : index
    %c0_6 = arith.constant 0 : index
    %7 = vector.load %arg1[%c0_4, %c0_5, %c0_6] : memref<1x64x1xi32, #tpu.memory_space<vmem>>, vector<1x64x1xi32>
    %8 = vector.shape_cast %7 : vector<1x64x1xi32> to vector<64x1xi32>
    %9 = tpu.iota {dimensions = array<i32: 1>} : vector<64x16xi32>
    %10 = vector.broadcast %8 : vector<64x1xi32> to vector<64x16xi32>
    %11 = arith.cmpi eq, %10, %9 : vector<64x16xi32>
    %12 = arith.extui %11 : vector<64x16xi1> to vector<64x16xi32>
    %13 = arith.sitofp %12 : vector<64x16xi32> to vector<64x16xf32>
    %14 = arith.truncf %13 : vector<64x16xf32> to vector<64x16xbf16>
    %cst_7 = arith.constant dense<0.000000e+00> : vector<64x128xf32>
    %15 = tpu.matmul %14, %5, %cst_7 {dimension_numbers = #tpu.dot_dimension_numbers<[1], [0], [0], [1], [0, 0, 1, 1], [], []>} : vector<64x16xbf16>, vector<16x128xbf16>, vector<64x128xf32> -> vector<64x128xf32>
    %16 = vector.extract_strided_slice %15 {offsets = [0, 0], sizes = [16, 128], strides = [1, 1]} : vector<64x128xf32> to vector<16x128xf32>
    %17 = vector.extract_strided_slice %15 {offsets = [16, 0], sizes = [16, 128], strides = [1, 1]} : vector<64x128xf32> to vector<16x128xf32>
    %18 = arith.maximumf %16, %17 : vector<16x128xf32>
    %19 = vector.extract_strided_slice %15 {offsets = [32, 0], sizes = [16, 128], strides = [1, 1]} : vector<64x128xf32> to vector<16x128xf32>
    %20 = arith.maximumf %18, %19 : vector<16x128xf32>
    %21 = vector.extract_strided_slice %15 {offsets = [48, 0], sizes = [16, 128], strides = [1, 1]} : vector<64x128xf32> to vector<16x128xf32>
    %22 = arith.maximumf %20, %21 : vector<16x128xf32>
    %23 = arith.addf %22, %6 : vector<16x128xf32>
    %c0_8 = arith.constant 0 : index
    %c0_9 = arith.constant 0 : index
    %24 = vector.load %arg4[%c0_8, %c0_9] : memref<1x128xf32, #tpu.memory_space<vmem>>, vector<1x128xf32>
    %25 = vector.broadcast %24 : vector<1x128xf32> to vector<16x128xf32>
    %26 = arith.addf %23, %25 : vector<16x128xf32>
    %cst_10 = arith.constant 0.000000e+00 : f32
    %27 = vector.broadcast %cst_10 : f32 to vector<16x128xf32>
    %28 = arith.cmpf oge, %26, %27 : vector<16x128xf32>
    %cst_11 = arith.constant 2.000000e-01 : f32
    %29 = vector.broadcast %cst_11 : f32 to vector<16x128xf32>
    %30 = arith.mulf %29, %26 : vector<16x128xf32>
    %31 = arith.select %28, %26, %30 : vector<16x128xi1>, vector<16x128xf32>
    %32 = arith.truncf %31 : vector<16x128xf32> to vector<16x128xbf16>
    %c0_12 = arith.constant 0 : index
    %c0_13 = arith.constant 0 : index
    %c0_14 = arith.constant 0 : index
    %33 = vector.load %arg5[%c0_12, %c0_13, %c0_14] : memref<1x16x128xbf16, #tpu.memory_space<vmem>>, vector<1x16x128xbf16>
    %34 = vector.shape_cast %33 : vector<1x16x128xbf16> to vector<16x128xbf16>
    %35 = vector.shape_cast %32 : vector<16x128xbf16> to vector<1x16x128xbf16>
    tpu.vector_store %arg5[%c0_12, %c0_13, %c0_14], %35 {strides = array<i32>} : memref<1x16x128xbf16, #tpu.memory_space<vmem>>, vector<1x16x128xbf16>,
    return
  }
  func.func @transform_0(%arg0: i32) -> (i32, i32, i32) {
    %c0_i32 = arith.constant 0 : i32
    %c0_i32_0 = arith.constant 0 : i32
    %c0_i32_1 = arith.constant 0 : i32
    return %arg0, %c0_i32, %c0_i32_0 : i32, i32, i32
  }
  func.func @transform_1(%arg0: i32) -> (i32, i32, i32) {
    %c0_i32 = arith.constant 0 : i32
    %c0_i32_0 = arith.constant 0 : i32
    %c0_i32_1 = arith.constant 0 : i32
    return %arg0, %c0_i32, %c0_i32_0 : i32, i32, i32
  }
  func.func @transform_2(%arg0: i32) -> (i32, i32) {
    %c0_i32 = arith.constant 0 : i32
    %c0_i32_0 = arith.constant 0 : i32
    %c0_i32_1 = arith.constant 0 : i32
    return %c0_i32, %c0_i32_0 : i32, i32
  }
  func.func @transform_3(%arg0: i32) -> (i32, i32) {
    %c0_i32 = arith.constant 0 : i32
    %c0_i32_0 = arith.constant 0 : i32
    %c0_i32_1 = arith.constant 0 : i32
    return %c0_i32, %c0_i32_0 : i32, i32
  }
  func.func @transform_4(%arg0: i32) -> (i32, i32, i32) {
    %c0_i32 = arith.constant 0 : i32
    %c0_i32_0 = arith.constant 0 : i32
    %c0_i32_1 = arith.constant 0 : i32
    return %arg0, %c0_i32, %c0_i32_0 : i32, i32, i32
  }
}

module attributes {stable_mosaic.version = 11 : i64} {
  func.func @edgeconv_kernel(%arg0: i32, %arg1: memref<1x64x1xi32, #tpu.memory_space<vmem>>, %arg2: memref<1x16x128xbf16, #tpu.memory_space<vmem>>, %arg3: memref<128x512xbf16, #tpu.memory_space<vmem>>, %arg4: memref<1x256xf32, #tpu.memory_space<vmem>>, %arg5: memref<1x16x256xbf16, #tpu.memory_space<vmem>>) attributes {dimension_semantics = [#tpu.dimension_semantics<parallel>], iteration_bounds = array<i64: 2>, scalar_prefetch = 0 : i64, scratch_operands = 0 : i64, tpu.core_type = #tpu.core_type<tc>, window_params = [{transform_indices = @transform_0, window_bounds = array<i64: 1, 64, 1>}, {transform_indices = @transform_1, window_bounds = array<i64: 1, 16, 128>}, {pipeline_mode = #tpu.pipeline_mode<synchronous>, transform_indices = @transform_2, window_bounds = array<i64: 128, 512>}, {pipeline_mode = #tpu.pipeline_mode<synchronous>, transform_indices = @transform_3, window_bounds = array<i64: 1, 256>}, {transform_indices = @transform_4, window_bounds = array<i64: 1, 16, 256>}]} {
    %c0 = arith.constant 0 : index
    %c0_0 = arith.constant 0 : index
    %c0_1 = arith.constant 0 : index
    %0 = vector.load %arg2[%c0, %c0_0, %c0_1] : memref<1x16x128xbf16, #tpu.memory_space<vmem>>, vector<1x16x128xbf16>
    %1 = vector.shape_cast %0 : vector<1x16x128xbf16> to vector<16x128xbf16>
    %c0_2 = arith.constant 0 : index
    %c0_3 = arith.constant 0 : index
    %2 = vector.load %arg3[%c0_2, %c0_3] : memref<128x512xbf16, #tpu.memory_space<vmem>>, vector<128x512xbf16>
    %cst = arith.constant dense<0.000000e+00> : vector<16x512xf32>
    %3 = tpu.matmul %1, %2, %cst {dimension_numbers = #tpu.dot_dimension_numbers<[1], [0], [0], [1], [0, 0, 1, 1], [], []>} : vector<16x128xbf16>, vector<128x512xbf16>, vector<16x512xf32> -> vector<16x512xf32>
    %4 = vector.extract_strided_slice %3 {offsets = [0, 0], sizes = [16, 256], strides = [1, 1]} : vector<16x512xf32> to vector<16x256xf32>
    %5 = arith.truncf %4 : vector<16x256xf32> to vector<16x256xbf16>
    %6 = vector.extract_strided_slice %3 {offsets = [0, 256], sizes = [16, 256], strides = [1, 1]} : vector<16x512xf32> to vector<16x256xf32>
    %c0_4 = arith.constant 0 : index
    %c0_5 = arith.constant 0 : index
    %c0_6 = arith.constant 0 : index
    %7 = vector.load %arg1[%c0_4, %c0_5, %c0_6] : memref<1x64x1xi32, #tpu.memory_space<vmem>>, vector<1x64x1xi32>
    %8 = vector.shape_cast %7 : vector<1x64x1xi32> to vector<64x1xi32>
    %9 = tpu.iota {dimensions = array<i32: 1>} : vector<64x16xi32>
    %10 = vector.broadcast %8 : vector<64x1xi32> to vector<64x16xi32>
    %11 = arith.cmpi eq, %10, %9 : vector<64x16xi32>
    %12 = arith.extui %11 : vector<64x16xi1> to vector<64x16xi32>
    %13 = arith.sitofp %12 : vector<64x16xi32> to vector<64x16xf32>
    %14 = arith.truncf %13 : vector<64x16xf32> to vector<64x16xbf16>
    %cst_7 = arith.constant dense<0.000000e+00> : vector<64x256xf32>
    %15 = tpu.matmul %14, %5, %cst_7 {dimension_numbers = #tpu.dot_dimension_numbers<[1], [0], [0], [1], [0, 0, 1, 1], [], []>} : vector<64x16xbf16>, vector<16x256xbf16>, vector<64x256xf32> -> vector<64x256xf32>
    %16 = vector.extract_strided_slice %15 {offsets = [0, 0], sizes = [16, 256], strides = [1, 1]} : vector<64x256xf32> to vector<16x256xf32>
    %17 = vector.extract_strided_slice %15 {offsets = [16, 0], sizes = [16, 256], strides = [1, 1]} : vector<64x256xf32> to vector<16x256xf32>
    %18 = arith.maximumf %16, %17 : vector<16x256xf32>
    %19 = vector.extract_strided_slice %15 {offsets = [32, 0], sizes = [16, 256], strides = [1, 1]} : vector<64x256xf32> to vector<16x256xf32>
    %20 = arith.maximumf %18, %19 : vector<16x256xf32>
    %21 = vector.extract_strided_slice %15 {offsets = [48, 0], sizes = [16, 256], strides = [1, 1]} : vector<64x256xf32> to vector<16x256xf32>
    %22 = arith.maximumf %20, %21 : vector<16x256xf32>
    %23 = arith.addf %22, %6 : vector<16x256xf32>
    %c0_8 = arith.constant 0 : index
    %c0_9 = arith.constant 0 : index
    %24 = vector.load %arg4[%c0_8, %c0_9] : memref<1x256xf32, #tpu.memory_space<vmem>>, vector<1x256xf32>
    %25 = vector.broadcast %24 : vector<1x256xf32> to vector<16x256xf32>
    %26 = arith.addf %23, %25 : vector<16x256xf32>
    %cst_10 = arith.constant 0.000000e+00 : f32
    %27 = vector.broadcast %cst_10 : f32 to vector<16x256xf32>
    %28 = arith.cmpf oge, %26, %27 : vector<16x256xf32>
    %cst_11 = arith.constant 2.000000e-01 : f32
    %29 = vector.broadcast %cst_11 : f32 to vector<16x256xf32>
    %30 = arith.mulf %29, %26 : vector<16x256xf32>
    %31 = arith.select %28, %26, %30 : vector<16x256xi1>, vector<16x256xf32>
    %32 = arith.truncf %31 : vector<16x256xf32> to vector<16x256xbf16>
    %c0_12 = arith.constant 0 : index
    %c0_13 = arith.constant 0 : index
    %c0_14 = arith.constant 0 : index
    %33 = vector.load %arg5[%c0_12, %c0_13, %c0_14] : memref<1x16x256xbf16, #tpu.memory_space<vmem>>, vector<1x16x256xbf16>
    %34 = vector.shape_cast %33 : vector<1x16x256xbf16> to vector<16x256xbf16>
    %35 = vector.shape_cast %32 : vector<16x256xbf16> to vector<1x16x256xbf16>
    tpu.vector_store %arg5[%c0_12, %c0_13, %c0_14], %35 {strides = array<i32>} : memref<1x16x256xbf16, #tpu.memory_space<vmem>>, vector<1x16x256xbf16>,
    return
  }
  func.func @transform_0(%arg0: i32) -> (i32, i32, i32) {
    %c0_i32 = arith.constant 0 : i32
    %c0_i32_0 = arith.constant 0 : i32
    %c0_i32_1 = arith.constant 0 : i32
    return %arg0, %c0_i32, %c0_i32_0 : i32, i32, i32
  }
  func.func @transform_1(%arg0: i32) -> (i32, i32, i32) {
    %c0_i32 = arith.constant 0 : i32
    %c0_i32_0 = arith.constant 0 : i32
    %c0_i32_1 = arith.constant 0 : i32
    return %arg0, %c0_i32, %c0_i32_0 : i32, i32, i32
  }
  func.func @transform_2(%arg0: i32) -> (i32, i32) {
    %c0_i32 = arith.constant 0 : i32
    %c0_i32_0 = arith.constant 0 : i32
    %c0_i32_1 = arith.constant 0 : i32
    return %c0_i32, %c0_i32_0 : i32, i32
  }
  func.func @transform_3(%arg0: i32) -> (i32, i32) {
    %c0_i32 = arith.constant 0 : i32
    %c0_i32_0 = arith.constant 0 : i32
    %c0_i32_1 = arith.constant 0 : i32
    return %c0_i32, %c0_i32_0 : i32, i32
  }
  func.func @transform_4(%arg0: i32) -> (i32, i32, i32) {
    %c0_i32 = arith.constant 0 : i32
    %c0_i32_0 = arith.constant 0 : i32
    %c0_i32_1 = arith.constant 0 : i32
    return %arg0, %c0_i32, %c0_i32_0 : i32, i32, i32
  }
}

module attributes {stable_mosaic.version = 11 : i64} {
  func.func @conv5_pool_kernel(%arg0: i32, %arg1: memref<1x16x64xbf16, #tpu.memory_space<vmem>>, %arg2: memref<1x16x64xbf16, #tpu.memory_space<vmem>>, %arg3: memref<1x16x128xbf16, #tpu.memory_space<vmem>>, %arg4: memref<1x16x256xbf16, #tpu.memory_space<vmem>>, %arg5: memref<64x64xbf16, #tpu.memory_space<vmem>>, %arg6: memref<64x64xbf16, #tpu.memory_space<vmem>>, %arg7: memref<128x64xbf16, #tpu.memory_space<vmem>>, %arg8: memref<256x64xbf16, #tpu.memory_space<vmem>>, %arg9: memref<1x64xf32, #tpu.memory_space<vmem>>, %arg10: memref<1x1x64xf32, #tpu.memory_space<vmem>>, %arg11: memref<1x1x64xf32, #tpu.memory_space<vmem>>) attributes {dimension_semantics = [#tpu.dimension_semantics<parallel>], iteration_bounds = array<i64: 2>, scalar_prefetch = 0 : i64, scratch_operands = 0 : i64, tpu.core_type = #tpu.core_type<tc>, window_params = [{transform_indices = @transform_0, window_bounds = array<i64: 1, 16, 64>}, {transform_indices = @transform_1, window_bounds = array<i64: 1, 16, 64>}, {transform_indices = @transform_2, window_bounds = array<i64: 1, 16, 128>}, {transform_indices = @transform_3, window_bounds = array<i64: 1, 16, 256>}, {pipeline_mode = #tpu.pipeline_mode<synchronous>, transform_indices = @transform_4, window_bounds = array<i64: 64, 64>}, {pipeline_mode = #tpu.pipeline_mode<synchronous>, transform_indices = @transform_5, window_bounds = array<i64: 64, 64>}, {pipeline_mode = #tpu.pipeline_mode<synchronous>, transform_indices = @transform_6, window_bounds = array<i64: 128, 64>}, {pipeline_mode = #tpu.pipeline_mode<synchronous>, transform_indices = @transform_7, window_bounds = array<i64: 256, 64>}, {pipeline_mode = #tpu.pipeline_mode<synchronous>, transform_indices = @transform_8, window_bounds = array<i64: 1, 64>}, {transform_indices = @transform_9, window_bounds = array<i64: 1, 1, 64>}, {transform_indices = @transform_10, window_bounds = array<i64: 1, 1, 64>}]} {
    %c0 = arith.constant 0 : index
    %c0_0 = arith.constant 0 : index
    %c0_1 = arith.constant 0 : index
    %0 = vector.load %arg1[%c0, %c0_0, %c0_1] : memref<1x16x64xbf16, #tpu.memory_space<vmem>>, vector<1x16x64xbf16>
    %1 = vector.shape_cast %0 : vector<1x16x64xbf16> to vector<16x64xbf16>
    %c0_2 = arith.constant 0 : index
    %c0_3 = arith.constant 0 : index
    %2 = vector.load %arg5[%c0_2, %c0_3] : memref<64x64xbf16, #tpu.memory_space<vmem>>, vector<64x64xbf16>
    %cst = arith.constant dense<0.000000e+00> : vector<16x64xf32>
    %3 = tpu.matmul %1, %2, %cst {dimension_numbers = #tpu.dot_dimension_numbers<[1], [0], [0], [1], [0, 0, 1, 1], [], []>} : vector<16x64xbf16>, vector<64x64xbf16>, vector<16x64xf32> -> vector<16x64xf32>
    %c0_4 = arith.constant 0 : index
    %c0_5 = arith.constant 0 : index
    %c0_6 = arith.constant 0 : index
    %4 = vector.load %arg2[%c0_4, %c0_5, %c0_6] : memref<1x16x64xbf16, #tpu.memory_space<vmem>>, vector<1x16x64xbf16>
    %5 = vector.shape_cast %4 : vector<1x16x64xbf16> to vector<16x64xbf16>
    %c0_7 = arith.constant 0 : index
    %c0_8 = arith.constant 0 : index
    %6 = vector.load %arg6[%c0_7, %c0_8] : memref<64x64xbf16, #tpu.memory_space<vmem>>, vector<64x64xbf16>
    %cst_9 = arith.constant dense<0.000000e+00> : vector<16x64xf32>
    %7 = tpu.matmul %5, %6, %cst_9 {dimension_numbers = #tpu.dot_dimension_numbers<[1], [0], [0], [1], [0, 0, 1, 1], [], []>} : vector<16x64xbf16>, vector<64x64xbf16>, vector<16x64xf32> -> vector<16x64xf32>
    %8 = arith.addf %3, %7 : vector<16x64xf32>
    %c0_10 = arith.constant 0 : index
    %c0_11 = arith.constant 0 : index
    %c0_12 = arith.constant 0 : index
    %9 = vector.load %arg3[%c0_10, %c0_11, %c0_12] : memref<1x16x128xbf16, #tpu.memory_space<vmem>>, vector<1x16x128xbf16>
    %10 = vector.shape_cast %9 : vector<1x16x128xbf16> to vector<16x128xbf16>
    %c0_13 = arith.constant 0 : index
    %c0_14 = arith.constant 0 : index
    %11 = vector.load %arg7[%c0_13, %c0_14] : memref<128x64xbf16, #tpu.memory_space<vmem>>, vector<128x64xbf16>
    %cst_15 = arith.constant dense<0.000000e+00> : vector<16x64xf32>
    %12 = tpu.matmul %10, %11, %cst_15 {dimension_numbers = #tpu.dot_dimension_numbers<[1], [0], [0], [1], [0, 0, 1, 1], [], []>} : vector<16x128xbf16>, vector<128x64xbf16>, vector<16x64xf32> -> vector<16x64xf32>
    %13 = arith.addf %8, %12 : vector<16x64xf32>
    %c0_16 = arith.constant 0 : index
    %c0_17 = arith.constant 0 : index
    %c0_18 = arith.constant 0 : index
    %14 = vector.load %arg4[%c0_16, %c0_17, %c0_18] : memref<1x16x256xbf16, #tpu.memory_space<vmem>>, vector<1x16x256xbf16>
    %15 = vector.shape_cast %14 : vector<1x16x256xbf16> to vector<16x256xbf16>
    %c0_19 = arith.constant 0 : index
    %c0_20 = arith.constant 0 : index
    %16 = vector.load %arg8[%c0_19, %c0_20] : memref<256x64xbf16, #tpu.memory_space<vmem>>, vector<256x64xbf16>
    %cst_21 = arith.constant dense<0.000000e+00> : vector<16x64xf32>
    %17 = tpu.matmul %15, %16, %cst_21 {dimension_numbers = #tpu.dot_dimension_numbers<[1], [0], [0], [1], [0, 0, 1, 1], [], []>} : vector<16x256xbf16>, vector<256x64xbf16>, vector<16x64xf32> -> vector<16x64xf32>
    %18 = arith.addf %13, %17 : vector<16x64xf32>
    %c0_22 = arith.constant 0 : index
    %c0_23 = arith.constant 0 : index
    %19 = vector.load %arg9[%c0_22, %c0_23] : memref<1x64xf32, #tpu.memory_space<vmem>>, vector<1x64xf32>
    %20 = vector.broadcast %19 : vector<1x64xf32> to vector<16x64xf32>
    %21 = arith.addf %18, %20 : vector<16x64xf32>
    %cst_24 = arith.constant 0.000000e+00 : f32
    %22 = vector.broadcast %cst_24 : f32 to vector<16x64xf32>
    %23 = arith.cmpf oge, %21, %22 : vector<16x64xf32>
    %cst_25 = arith.constant 2.000000e-01 : f32
    %24 = vector.broadcast %cst_25 : f32 to vector<16x64xf32>
    %25 = arith.mulf %24, %21 : vector<16x64xf32>
    %26 = arith.select %23, %21, %25 : vector<16x64xi1>, vector<16x64xf32>
    %cst_26 = arith.constant dense<0xFF800000> : vector<64xf32>
    %27 = vector.multi_reduction <maximumf>, %26, %cst_26 [0] : vector<16x64xf32> to vector<64xf32>
    %28 = vector.shape_cast %27 : vector<64xf32> to vector<1x64xf32>
    %c0_27 = arith.constant 0 : index
    %c0_28 = arith.constant 0 : index
    %c0_29 = arith.constant 0 : index
    %29 = vector.load %arg10[%c0_27, %c0_28, %c0_29] : memref<1x1x64xf32, #tpu.memory_space<vmem>>, vector<1x1x64xf32>
    %30 = vector.shape_cast %29 : vector<1x1x64xf32> to vector<1x64xf32>
    %31 = vector.shape_cast %28 : vector<1x64xf32> to vector<1x1x64xf32>
    tpu.vector_store %arg10[%c0_27, %c0_28, %c0_29], %31 {strides = array<i32>} : memref<1x1x64xf32, #tpu.memory_space<vmem>>, vector<1x1x64xf32>,
    %cst_30 = arith.constant dense<0.000000e+00> : vector<64xf32>
    %32 = vector.multi_reduction <add>, %26, %cst_30 [0] : vector<16x64xf32> to vector<64xf32>
    %33 = vector.shape_cast %32 : vector<64xf32> to vector<1x64xf32>
    %cst_31 = arith.constant 1.600000e+01 : f32
    %34 = vector.broadcast %cst_31 : f32 to vector<1x64xf32>
    %35 = arith.divf %33, %34 : vector<1x64xf32>
    %c0_32 = arith.constant 0 : index
    %c0_33 = arith.constant 0 : index
    %c0_34 = arith.constant 0 : index
    %36 = vector.load %arg11[%c0_32, %c0_33, %c0_34] : memref<1x1x64xf32, #tpu.memory_space<vmem>>, vector<1x1x64xf32>
    %37 = vector.shape_cast %36 : vector<1x1x64xf32> to vector<1x64xf32>
    %38 = vector.shape_cast %35 : vector<1x64xf32> to vector<1x1x64xf32>
    tpu.vector_store %arg11[%c0_32, %c0_33, %c0_34], %38 {strides = array<i32>} : memref<1x1x64xf32, #tpu.memory_space<vmem>>, vector<1x1x64xf32>,
    return
  }
  func.func @transform_0(%arg0: i32) -> (i32, i32, i32) {
    %c0_i32 = arith.constant 0 : i32
    %c0_i32_0 = arith.constant 0 : i32
    %c0_i32_1 = arith.constant 0 : i32
    return %arg0, %c0_i32, %c0_i32_0 : i32, i32, i32
  }
  func.func @transform_1(%arg0: i32) -> (i32, i32, i32) {
    %c0_i32 = arith.constant 0 : i32
    %c0_i32_0 = arith.constant 0 : i32
    %c0_i32_1 = arith.constant 0 : i32
    return %arg0, %c0_i32, %c0_i32_0 : i32, i32, i32
  }
  func.func @transform_2(%arg0: i32) -> (i32, i32, i32) {
    %c0_i32 = arith.constant 0 : i32
    %c0_i32_0 = arith.constant 0 : i32
    %c0_i32_1 = arith.constant 0 : i32
    return %arg0, %c0_i32, %c0_i32_0 : i32, i32, i32
  }
  func.func @transform_3(%arg0: i32) -> (i32, i32, i32) {
    %c0_i32 = arith.constant 0 : i32
    %c0_i32_0 = arith.constant 0 : i32
    %c0_i32_1 = arith.constant 0 : i32
    return %arg0, %c0_i32, %c0_i32_0 : i32, i32, i32
  }
  func.func @transform_4(%arg0: i32) -> (i32, i32) {
    %c0_i32 = arith.constant 0 : i32
    %c0_i32_0 = arith.constant 0 : i32
    %c0_i32_1 = arith.constant 0 : i32
    return %c0_i32, %c0_i32_0 : i32, i32
  }
  func.func @transform_5(%arg0: i32) -> (i32, i32) {
    %c0_i32 = arith.constant 0 : i32
    %c0_i32_0 = arith.constant 0 : i32
    %c0_i32_1 = arith.constant 0 : i32
    return %c0_i32, %c0_i32_0 : i32, i32
  }
  func.func @transform_6(%arg0: i32) -> (i32, i32) {
    %c0_i32 = arith.constant 0 : i32
    %c0_i32_0 = arith.constant 0 : i32
    %c0_i32_1 = arith.constant 0 : i32
    return %c0_i32, %c0_i32_0 : i32, i32
  }
  func.func @transform_7(%arg0: i32) -> (i32, i32) {
    %c0_i32 = arith.constant 0 : i32
    %c0_i32_0 = arith.constant 0 : i32
    %c0_i32_1 = arith.constant 0 : i32
    return %c0_i32, %c0_i32_0 : i32, i32
  }
  func.func @transform_8(%arg0: i32) -> (i32, i32) {
    %c0_i32 = arith.constant 0 : i32
    %c0_i32_0 = arith.constant 0 : i32
    %c0_i32_1 = arith.constant 0 : i32
    return %c0_i32, %c0_i32_0 : i32, i32
  }
  func.func @transform_9(%arg0: i32) -> (i32, i32, i32) {
    %c0_i32 = arith.constant 0 : i32
    %c0_i32_0 = arith.constant 0 : i32
    %c0_i32_1 = arith.constant 0 : i32
    return %arg0, %c0_i32, %c0_i32_0 : i32, i32, i32
  }
  func.func @transform_10(%arg0: i32) -> (i32, i32, i32) {
    %c0_i32 = arith.constant 0 : i32
    %c0_i32_0 = arith.constant 0 : i32
    %c0_i32_1 = arith.constant 0 : i32
    return %arg0, %c0_i32, %c0_i32_0 : i32, i32, i32
  }
}

module attributes {stable_mosaic.version = 11 : i64} {
  func.func @head_kernel(%arg0: i32, %arg1: memref<8x128xf32, #tpu.memory_space<vmem>>, %arg2: memref<128x512xbf16, #tpu.memory_space<vmem>>, %arg3: memref<1x512xf32, #tpu.memory_space<vmem>>, %arg4: memref<512x256xbf16, #tpu.memory_space<vmem>>, %arg5: memref<1x256xf32, #tpu.memory_space<vmem>>, %arg6: memref<256x128xbf16, #tpu.memory_space<vmem>>, %arg7: memref<1x128xf32, #tpu.memory_space<vmem>>, %arg8: memref<8x128xf32, #tpu.memory_space<vmem>>) attributes {dimension_semantics = [#tpu.dimension_semantics<arbitrary>], iteration_bounds = array<i64: 1>, scalar_prefetch = 0 : i64, scratch_operands = 0 : i64, tpu.core_type = #tpu.core_type<tc>, window_params = [{pipeline_mode = #tpu.pipeline_mode<synchronous>, transform_indices = @transform_0, window_bounds = array<i64: 8, 128>}, {pipeline_mode = #tpu.pipeline_mode<synchronous>, transform_indices = @transform_1, window_bounds = array<i64: 128, 512>}, {pipeline_mode = #tpu.pipeline_mode<synchronous>, transform_indices = @transform_2, window_bounds = array<i64: 1, 512>}, {pipeline_mode = #tpu.pipeline_mode<synchronous>, transform_indices = @transform_3, window_bounds = array<i64: 512, 256>}, {pipeline_mode = #tpu.pipeline_mode<synchronous>, transform_indices = @transform_4, window_bounds = array<i64: 1, 256>}, {pipeline_mode = #tpu.pipeline_mode<synchronous>, transform_indices = @transform_5, window_bounds = array<i64: 256, 128>}, {pipeline_mode = #tpu.pipeline_mode<synchronous>, transform_indices = @transform_6, window_bounds = array<i64: 1, 128>}, {pipeline_mode = #tpu.pipeline_mode<synchronous>, transform_indices = @transform_7, window_bounds = array<i64: 8, 128>}]} {
    %c0 = arith.constant 0 : index
    %c0_0 = arith.constant 0 : index
    %0 = vector.load %arg1[%c0, %c0_0] : memref<8x128xf32, #tpu.memory_space<vmem>>, vector<8x128xf32>
    %1 = arith.truncf %0 : vector<8x128xf32> to vector<8x128xbf16>
    %c0_1 = arith.constant 0 : index
    %c0_2 = arith.constant 0 : index
    %2 = vector.load %arg2[%c0_1, %c0_2] : memref<128x512xbf16, #tpu.memory_space<vmem>>, vector<128x512xbf16>
    %cst = arith.constant dense<0.000000e+00> : vector<8x512xf32>
    %3 = tpu.matmul %1, %2, %cst {dimension_numbers = #tpu.dot_dimension_numbers<[1], [0], [0], [1], [0, 0, 1, 1], [], []>} : vector<8x128xbf16>, vector<128x512xbf16>, vector<8x512xf32> -> vector<8x512xf32>
    %c0_3 = arith.constant 0 : index
    %c0_4 = arith.constant 0 : index
    %4 = vector.load %arg3[%c0_3, %c0_4] : memref<1x512xf32, #tpu.memory_space<vmem>>, vector<1x512xf32>
    %5 = vector.broadcast %4 : vector<1x512xf32> to vector<8x512xf32>
    %6 = arith.addf %3, %5 : vector<8x512xf32>
    %cst_5 = arith.constant 0.000000e+00 : f32
    %7 = vector.broadcast %cst_5 : f32 to vector<8x512xf32>
    %8 = arith.cmpf oge, %6, %7 : vector<8x512xf32>
    %cst_6 = arith.constant 2.000000e-01 : f32
    %9 = vector.broadcast %cst_6 : f32 to vector<8x512xf32>
    %10 = arith.mulf %9, %6 : vector<8x512xf32>
    %11 = arith.select %8, %6, %10 : vector<8x512xi1>, vector<8x512xf32>
    %12 = arith.truncf %11 : vector<8x512xf32> to vector<8x512xbf16>
    %c0_7 = arith.constant 0 : index
    %c0_8 = arith.constant 0 : index
    %13 = vector.load %arg4[%c0_7, %c0_8] : memref<512x256xbf16, #tpu.memory_space<vmem>>, vector<512x256xbf16>
    %cst_9 = arith.constant dense<0.000000e+00> : vector<8x256xf32>
    %14 = tpu.matmul %12, %13, %cst_9 {dimension_numbers = #tpu.dot_dimension_numbers<[1], [0], [0], [1], [0, 0, 1, 1], [], []>} : vector<8x512xbf16>, vector<512x256xbf16>, vector<8x256xf32> -> vector<8x256xf32>
    %c0_10 = arith.constant 0 : index
    %c0_11 = arith.constant 0 : index
    %15 = vector.load %arg5[%c0_10, %c0_11] : memref<1x256xf32, #tpu.memory_space<vmem>>, vector<1x256xf32>
    %16 = vector.broadcast %15 : vector<1x256xf32> to vector<8x256xf32>
    %17 = arith.addf %14, %16 : vector<8x256xf32>
    %cst_12 = arith.constant 0.000000e+00 : f32
    %18 = vector.broadcast %cst_12 : f32 to vector<8x256xf32>
    %19 = arith.cmpf oge, %17, %18 : vector<8x256xf32>
    %cst_13 = arith.constant 2.000000e-01 : f32
    %20 = vector.broadcast %cst_13 : f32 to vector<8x256xf32>
    %21 = arith.mulf %20, %17 : vector<8x256xf32>
    %22 = arith.select %19, %17, %21 : vector<8x256xi1>, vector<8x256xf32>
    %23 = arith.truncf %22 : vector<8x256xf32> to vector<8x256xbf16>
    %c0_14 = arith.constant 0 : index
    %c0_15 = arith.constant 0 : index
    %24 = vector.load %arg6[%c0_14, %c0_15] : memref<256x128xbf16, #tpu.memory_space<vmem>>, vector<256x128xbf16>
    %cst_16 = arith.constant dense<0.000000e+00> : vector<8x128xf32>
    %25 = tpu.matmul %23, %24, %cst_16 {dimension_numbers = #tpu.dot_dimension_numbers<[1], [0], [0], [1], [0, 0, 1, 1], [], []>} : vector<8x256xbf16>, vector<256x128xbf16>, vector<8x128xf32> -> vector<8x128xf32>
    %c0_17 = arith.constant 0 : index
    %c0_18 = arith.constant 0 : index
    %26 = vector.load %arg7[%c0_17, %c0_18] : memref<1x128xf32, #tpu.memory_space<vmem>>, vector<1x128xf32>
    %27 = vector.broadcast %26 : vector<1x128xf32> to vector<8x128xf32>
    %28 = arith.addf %25, %27 : vector<8x128xf32>
    %c0_19 = arith.constant 0 : index
    %c0_20 = arith.constant 0 : index
    %29 = vector.load %arg8[%c0_19, %c0_20] : memref<8x128xf32, #tpu.memory_space<vmem>>, vector<8x128xf32>
    tpu.vector_store %arg8[%c0_19, %c0_20], %28 {strides = array<i32>} : memref<8x128xf32, #tpu.memory_space<vmem>>, vector<8x128xf32>,
    return
  }
  func.func @transform_0(%arg0: i32) -> (i32, i32) {
    %c0_i32 = arith.constant 0 : i32
    %c0_i32_0 = arith.constant 0 : i32
    %c0_i32_1 = arith.constant 0 : i32
    return %c0_i32, %c0_i32_0 : i32, i32
  }
  func.func @transform_1(%arg0: i32) -> (i32, i32) {
    %c0_i32 = arith.constant 0 : i32
    %c0_i32_0 = arith.constant 0 : i32
    %c0_i32_1 = arith.constant 0 : i32
    return %c0_i32, %c0_i32_0 : i32, i32
  }
  func.func @transform_2(%arg0: i32) -> (i32, i32) {
    %c0_i32 = arith.constant 0 : i32
    %c0_i32_0 = arith.constant 0 : i32
    %c0_i32_1 = arith.constant 0 : i32
    return %c0_i32, %c0_i32_0 : i32, i32
  }
  func.func @transform_3(%arg0: i32) -> (i32, i32) {
    %c0_i32 = arith.constant 0 : i32
    %c0_i32_0 = arith.constant 0 : i32
    %c0_i32_1 = arith.constant 0 : i32
    return %c0_i32, %c0_i32_0 : i32, i32
  }
  func.func @transform_4(%arg0: i32) -> (i32, i32) {
    %c0_i32 = arith.constant 0 : i32
    %c0_i32_0 = arith.constant 0 : i32
    %c0_i32_1 = arith.constant 0 : i32
    return %c0_i32, %c0_i32_0 : i32, i32
  }
  func.func @transform_5(%arg0: i32) -> (i32, i32) {
    %c0_i32 = arith.constant 0 : i32
    %c0_i32_0 = arith.constant 0 : i32
    %c0_i32_1 = arith.constant 0 : i32
    return %c0_i32, %c0_i32_0 : i32, i32
  }
  func.func @transform_6(%arg0: i32) -> (i32, i32) {
    %c0_i32 = arith.constant 0 : i32
    %c0_i32_0 = arith.constant 0 : i32
    %c0_i32_1 = arith.constant 0 : i32
    return %c0_i32, %c0_i32_0 : i32, i32
  }
  func.func @transform_7(%arg0: i32) -> (i32, i32) {
    %c0_i32 = arith.constant 0 : i32
    %c0_i32_0 = arith.constant 0 : i32
    %c0_i32_1 = arith.constant 0 : i32
    return %c0_i32, %c0_i32_0 : i32, i32
  }
}

</mosaic_0001>

<bundles_post_ra>
// kernel: dgcnn_forward.6
= control target key start
LH: loop header
LB: loop body
LE: loop exit
PB: predicated region body
PF: predicated region fallthrough
CT: control target
= control target key end

     0   :  { %s635_s15 = smov 0   ;;  %s680_s0 = inlined_call_operand.vmem [shape: s32[2,64,1], index: 0, kind: input, shape index: {}]   ;;  %s681_s1 = inlined_call_operand.vmem [shape: f32[2,16,3], index: 1, kind: input, shape index: {}]   ;;  %s682_s2 = inlined_call_operand.vmem [shape: bf16[3,128], index: 2, kind: input, shape index: {}]   ;;  %s683_s3 = inlined_call_operand.vmem [shape: f32[1,64], index: 3, kind: input, shape index: {}]   ;;  %s684_s4 = inlined_call_operand.vmem [shape: bf16[2,16,64], index: 4, kind: output, shape index: {}]  }
   0x1 LB: > { %s525_s16 = sadd.s32 4294967295, %s603_s15   ;;  %p529_p0 = scmp.ge.s32.totalorder %s603_s15, 1  ;;  %s603_s15 = sphi %s635_s15, %s14_s15  }
   0x2   : > { %p172_p1 = scmp.lt.s32.totalorder %s603_s15, 3 }
   0x4   : > { %p173_p2 = pnand %p529_p0, %p172_p1 }
   0x5   : > { %p203_p3 = scmp.lt.s32.totalorder (!%p173_p2), %s525_s16, 1  ;;  %s609_s27 = smov (!%p173_p2), 64  }
   0x6   : > { %176 = sbr.rel (%p173_p2) target bundleno = 443 (0x1bb), region = 36 }
   0xb   : > { %v222_v0 = vld [vmem:[%s682_s2] sm:$0x3]  ;;  %vm227_vm0 = vcmask 1040384   ;;  %vm228_vm1 = vcmask 1041408   ;;  %v605_v1 = vmov 0.0   ;;  %v606_v2 = vmov 65535  }
   0xc   : > { %566 = vmatprep.subr.bf16.mxu0 %v605_v1  ;;  %v229_v3 = vsel %vm227_vm0, 4294967295, %v606_v2  ;;  %vm607_vm2 = vmmov 0   ;;  %v608_v5 = vmov 0   ;;  %s686_s16 = smov (!%p203_p3, %s525_s16), 1  ;;  %vm223_vm3 = vcmask 23552  }
   0xd   : > { %v230_v4 = vsel %vm228_vm1, %v229_v3, 0  ;;  %568 = vmatprep.mubr.msk.bf16.mxu0 %vm607_vm2, %v605_v1  ;;  %596 = vset.pattern.permute.xlu1 %v608_v5  ;;  %s555_s19 = sshll.u32 %s686_s16, 4  ;;  %s554_s20 = sshll.u32 %s686_s16, 6  ;;  %v284_v18 = vlaneseq  ;;  %vm338_vm6 = vcmask 130048   ;;  %v549_v57 = vld [vmem:[%s683_s3] ss:$0 sm:$0xff] }
   0xe   : > { %v232_v6 = vand.u32 %v230_v4, %v222_v0  ;;  %595 = vset.pattern.permute.xlu0 %v608_v5  ;;  %s212_s23 = scalar_lea.vmem %s681_s1, %s555_s19  ;;  %s207_s26 = scalar_lea.vmem %s680_s0, %s554_s20  ;;  %vm455_vm14 = vcmask 519168  }
   0xf   : > { %v219_v7 = vld [vmem:[%s212_s23] sm:$0xff]  ;;  %v220_v8 = vld [vmem:[%s212_s23 + $0x8] sm:$0xff]  ;;  %v278_v9 = vld [vmem:[%s207_s26 + $0x10] sm:$0xff]  ;;  %v285_v19 = vand.u32 127, %v284_v18  ;;  %s556_s30 = sshll.u32 %s686_s16, 3 }
  0x10   : > { %567 = vmatpush3.bf16.msra.mxu0 %v232_v6  ;;  %v221_v10 = vpack.c.bf16 %v220_v8, %v219_v7  ;;  %293 = vperm.xlu1 %596, %v278_v9   ;;  %v276_v11 = vld [vmem:[%s207_s26] sm:$0xff]  ;;  %v279_v12 = vld [vmem:[%s207_s26 + $0x18] sm:$0xff]  ;;  %v277_v13 = vld [vmem:[%s207_s26 + $0x8] sm:$0xff]  ;;  %s217_s7 = scalar_lea.vmem %s684_s4, %s556_s30 }
  0x11   : > { %287 = vperm.xlu0 %595, %v276_v11   ;;  %v281_v14 = vld [vmem:[%s207_s26 + $0x28] sm:$0xff]  ;;  %v280_v15 = vld [vmem:[%s207_s26 + $0x20] sm:$0xff]  ;;  %v283_v16 = vld [vmem:[%s207_s26 + $0x38] sm:$0xff] }
  0x12   : > { %v282_v17 = vld [vmem:[%s207_s26 + $0x30] sm:$0xff] }
  0x13   : > { %569 = vmatmul.mubr.msk.bf16.vlgmr.msra.gmra.mxu0 %vm223_vm3, %v221_v10 }
  0x14   : > { %296 = vperm.xlu1 %596, %v279_v12  }
  0x15   : > { %290 = vperm.xlu0 %595, %v277_v13  }
  0x18   : > { %302 = vperm.xlu1 %596, %v281_v14  }
  0x19   : > { %299 = vperm.xlu0 %595, %v280_v15  }
  0x1c   : > { %308 = vperm.xlu1 %596, %v283_v16  }
  0x1d   : > { %305 = vperm.xlu0 %595, %v282_v17  }
  0x8b   : > { %v294_v25 = vpop.permute.xlu1 %293 }
  0x8c   : > { %v288_v20 = vpop.permute.xlu0 %287  ;;  %vm312_vm7 = vcmp.eq.s32.totalorder %v294_v25, %v285_v19 }
  0x8d   : > { %vm310_vm4 = vcmp.eq.s32.totalorder %v288_v20, %v285_v19  ;;  %v539_v33 = vsel %vm312_vm7, 1.0, %v605_v1 }
  0x8e   : > { %v537_v21 = vsel %vm310_vm4, 1.0, %v605_v1 }
  0x8f   : > { %v297_v26 = vpop.permute.xlu1 %296 }
  0x90   : > { %v291_v22 = vpop.permute.xlu0 %290  ;;  %vm313_vm8 = vcmp.eq.s32.totalorder %v297_v26, %v285_v19 }
  0x91   : > { %vm311_vm5 = vcmp.eq.s32.totalorder %v291_v22, %v285_v19  ;;  %v540_v34 = vsel %vm313_vm8, 1.0, %v605_v1 }
  0x92   : > { %v538_v23 = vsel %vm311_vm5, 1.0, %v605_v1  ;;  %v335_v40 = vpack.c.bf16 %v540_v34, %v539_v33 }
  0x93   : > { %v334_v24 = vpack.c.bf16 %v538_v23, %v537_v21  ;;  %v303_v28 = vpop.permute.xlu1 %302 }
  0x94   : > { %v300_v29 = vpop.permute.xlu0 %299  ;;  %vm315_vm9 = vcmp.eq.s32.totalorder %v303_v28, %v285_v19 }
  0x95   : > { %574 = vmatprep.mubr.msk.bf16.mxu1 %vm338_vm6, %v334_v24  ;;  %vm314_vm10 = vcmp.eq.s32.totalorder %v300_v29, %v285_v19  ;;  %v542_v36 = vsel %vm315_vm9, 1.0, %v605_v1 }
  0x96   : > { %v541_v37 = vsel %vm314_vm10, 1.0, %v605_v1 }
  0x97   : > { %v309_v38 = vpop.permute.xlu1 %308  ;;  %v336_v41 = vpack.c.bf16 %v542_v36, %v541_v37 }
  0x98   : > { %v306_v39 = vpop.permute.xlu0 %305  ;;  %vm317_vm11 = vcmp.eq.s32.totalorder %v309_v38, %v285_v19 }
  0x99   : > { %vm316_vm12 = vcmp.eq.s32.totalorder %v306_v39, %v285_v19  ;;  %v544_v42 = vsel %vm317_vm11, 1.0, %v605_v1 }
  0x9a   : > { %v543_v43 = vsel %vm316_vm12, 1.0, %v605_v1 }
  0x9b   : > { %v337_v44 = vpack.c.bf16 %v544_v42, %v543_v43 }
  0xd3   : > { %v268_v27 = vpop.f32.mrf.mxu0 }
  0xd4   : > { %424 = vrot.lane.b32.xlu0 %v268_v27, %s609_s27 }
  0xd5   : > { %v570_v30 = vpop.f32.mrf.mxu0 }
  0xd7   : > { %v271_v31 = vpop.f32.mrf.mxu0 }
  0xd8   : > { %426 = vrot.lane.b32.xlu1 %v271_v31, %s609_s27  ;;  %v275_v32 = vpack.c.bf16 %v271_v31, %v268_v27 }
  0xd9   : > { %v571_v35 = vpop.f32.mrf.mxu0 }
  0xda   : > { %572 = vmatprep.subr.bf16.mxu1 %v275_v32 }
  0xdb   : > { %573 = vmatpush3.bf16.msra.mxu1 %v275_v32 }
  0xde   : > { %575 = vmatmul.mubr.msk.bf16.vlgmr.msra.gmra.mxu1 %vm338_vm6, %v335_v40 }
  0xdf   : > { %578 = vmatprep.mubr.msk.bf16.mxu1 %vm338_vm6, %v336_v41 }
  0xe6   : > { %579 = vmatmul.mubr.msk.bf16.gmra.mxu1 %vm338_vm6, %v337_v44 }
 0x146   : > { %v425_v56 = vpop.permute.xlu0 %424 }
 0x14a   : > { %v427_v63 = vpop.permute.xlu1 %426 }
 0x19e   : > { %v576_v45 = vpop.f32.mrf.mxu1 }
 0x1a0   : > { %v385_v46 = vpop.f32.mrf.mxu1 }
 0x1a1   : > { %v416_v50 = vmax.f32 %v385_v46, %v576_v45 }
 0x1a2   : > { %v577_v47 = vpop.f32.mrf.mxu1 }
 0x1a4   : > { %v388_v48 = vpop.f32.mrf.mxu1 }
 0x1a5   : > { %v417_v54 = vmax.f32 %v388_v48, %v577_v47 }
 0x1a6   : > { %v580_v49 = vpop.f32.mrf.mxu1 }
 0x1a8   : > { %v401_v51 = vpop.f32.mrf.mxu1 }
 0x1a9   : > { %v418_v52 = vmax.f32 %v416_v50, %v401_v51 }
 0x1aa   : > { %v581_v53 = vpop.f32.mrf.mxu1 }
 0x1ab   : > { %v420_v55 = vmax.f32 %v418_v52, %v580_v49 }
 0x1ac   : > { %v404_v58 = vpop.f32.mrf.mxu1 }
 0x1ad   : > { %v430_v59 = vadd.f32 %v425_v56, %v420_v55  ;;  %v419_v60 = vmax.f32 %v417_v54, %v404_v58 }
 0x1af   : > { %v439_v61 = vadd.f32 %v549_v57, %v430_v59  ;;  %v421_v62 = vmax.f32 %v419_v60, %v581_v53 }
 0x1b1   : > { %vm441_vm13 = vcmp.ge.f32.partialorder %v439_v61, 0.0  ;;  %v443_v0 = vmul.f32 0.2, %v439_v61  ;;  %v431_v1 = vadd.f32 %v427_v63, %v421_v62 }
 0x1b3   : > { %v445_v2 = vsel %vm441_vm13, %v439_v61, %v443_v0  ;;  %v440_v3 = vadd.f32 %v549_v57, %v431_v1 }
 0x1b4   : > { %v557_v4 = vpack.c.bf16 %v445_v2, %v445_v2 }
 0x1b5   : > { %vm442_vm15 = vcmp.ge.f32.partialorder %v440_v3, 0.0  ;;  %v444_v5 = vmul.f32 0.2, %v440_v3 }
 0x1b6   : > { %456 = vst.msk [vmem:[%s217_s7] sm:$0xf] %vm455_vm14, %v557_v4 }
 0x1b7   : > { %v446_v6 = vsel %vm442_vm15, %v440_v3, %v444_v5 }
 0x1b8   : > { %v558_v7 = vpack.c.bf16 %v446_v6, %v446_v6 }
 0x1ba   : > { %457 = vst.msk [vmem:[%s217_s7 + $0x4] sm:$0xf] %vm455_vm14, %v558_v7 }
 0x1bb PF: > { %s14_s15 = sadd.s32 1, %s603_s15  }
 0x1bc   : > { %p11_p4 = scmp.ge.s32.totalorder %s14_s15, 4  }
 0x1be   :  { %13 = sbr.rel (!%p11_p4) target bundleno = 1 (0x1), region = 69 }

// kernel: dgcnn_forward.7
= control target key start
LH: loop header
LB: loop body
LE: loop exit
PB: predicated region body
PF: predicated region fallthrough
CT: control target
= control target key end

     0   :  { %s680_s15 = smov 0   ;;  %s740_s0 = inlined_call_operand.vmem [shape: s32[2,64,1], index: 0, kind: input, shape index: {}]   ;;  %s741_s1 = inlined_call_operand.vmem [shape: bf16[2,16,64], index: 1, kind: input, shape index: {}]   ;;  %s742_s2 = inlined_call_operand.vmem [shape: bf16[64,128], index: 2, kind: input, shape index: {}]   ;;  %s743_s3 = inlined_call_operand.vmem [shape: f32[1,64], index: 3, kind: input, shape index: {}]   ;;  %s744_s4 = inlined_call_operand.vmem [shape: bf16[2,16,64], index: 4, kind: output, shape index: {}]  }
   0x1 LB: > { %s553_s16 = sadd.s32 4294967295, %s649_s15   ;;  %p557_p0 = scmp.ge.s32.totalorder %s649_s15, 1  ;;  %s649_s15 = sphi %s680_s15, %s14_s15  }
   0x2   : > { %p172_p1 = scmp.lt.s32.totalorder %s649_s15, 3 }
   0x4   : > { %p173_p2 = pnand %p557_p0, %p172_p1 }
   0x5   : > { %p203_p3 = scmp.lt.s32.totalorder (!%p173_p2), %s553_s16, 1  ;;  %s654_s7 = smov (!%p173_p2), 64  }
   0x6   : > { %176 = sbr.rel (%p173_p2) target bundleno = 452 (0x1c4), region = 36 }
   0xb   : > { %v638_v0 = vld [vmem:[%s742_s2 + $0x18] sm:$0xff]   ;;  %v651_v1 = vmov 0.0   ;;  %v639_v2 = vld [vmem:[%s742_s2 + $0x10] sm:$0xff]   ;;  %vm652_vm0 = vmmov 0   ;;  %s746_s16 = smov (!%p203_p3, %s553_s16), 1  ;;  %v653_v3 = vmov 0   ;;  %v312_v15 = vlaneseq }
   0xc   : > { %602 = vmatprep.subr.bf16.mxu0 %v651_v1  ;;  %610 = vmatprep.mubr.msk.bf16.mxu0 %vm652_vm0, %v651_v1  ;;  %v640_v4 = vld [vmem:[%s742_s2 + $0x8] sm:$0xff]   ;;  %s587_s23 = sshll.u32 %s746_s16, 6  ;;  %s588_s24 = sshll.u32 %s746_s16, 3  ;;  %v641_v7 = vld [vmem:[%s742_s2] sm:$0xff]   ;;  %vm258_vm1 = vcmask 523264   ;;  %vm366_vm4 = vcmask 130048  }
   0xd   : > { %603 = vmatpush3.bf16.msra.mxu0 %v638_v0  ;;  %637 = vset.pattern.permute.xlu1 %v653_v3  ;;  %s207_s27 = scalar_lea.vmem %s740_s0, %s587_s23  ;;  %s212_s30 = scalar_lea.vmem %s741_s1, %s588_s24  ;;  %v313_v16 = vand.u32 127, %v312_v15  ;;  %v582_v54 = vld [vmem:[%s743_s3] ss:$0 sm:$0xff]  ;;  %vm483_vm12 = vcmask 519168  }
   0xe   : > { %604 = vmatprep.subr.bf16.mxu0 %v651_v1  ;;  %636 = vset.pattern.permute.xlu0 %v653_v3  ;;  %v306_v5 = vld [vmem:[%s207_s27 + $0x10] sm:$0xff]  ;;  %v304_v6 = vld [vmem:[%s207_s27] sm:$0xff]  ;;  %v307_v8 = vld [vmem:[%s207_s27 + $0x18] sm:$0xff]  ;;  %s217_s12 = scalar_lea.vmem %s744_s4, %s588_s24 }
   0xf   : > { %321 = vperm.xlu1 %637, %v306_v5   ;;  %315 = vperm.xlu0 %636, %v304_v6   ;;  %v305_v9 = vld [vmem:[%s207_s27 + $0x8] sm:$0xff]  ;;  %v642_v10 = vld [vmem:[%s212_s30] sm:$0xff]   ;;  %v311_v13 = vld [vmem:[%s207_s27 + $0x38] sm:$0xff] }
  0x10   : > { %v309_v11 = vld [vmem:[%s207_s27 + $0x28] sm:$0xff]  ;;  %v308_v12 = vld [vmem:[%s207_s27 + $0x20] sm:$0xff]  ;;  %v310_v14 = vld [vmem:[%s207_s27 + $0x30] sm:$0xff] }
  0x11   : > { %605 = vmatpush3.bf16.msra.mxu0 %v639_v2 }
  0x12   : > { %606 = vmatprep.subr.bf16.mxu0 %v651_v1 }
  0x13   : > { %324 = vperm.xlu1 %637, %v307_v8   ;;  %318 = vperm.xlu0 %636, %v305_v9  }
  0x15   : > { %607 = vmatpush3.bf16.msra.mxu0 %v640_v4 }
  0x16   : > { %608 = vmatprep.subr.bf16.mxu0 %v651_v1 }
  0x17   : > { %330 = vperm.xlu1 %637, %v309_v11   ;;  %327 = vperm.xlu0 %636, %v308_v12  }
  0x19   : > { %609 = vmatpush3.bf16.msra.mxu0 %v641_v7 }
  0x1b   : > { %336 = vperm.xlu1 %637, %v311_v13   ;;  %333 = vperm.xlu0 %636, %v310_v14  }
  0x1c   : > { %611 = vmatmul.mubr.msk.bf16.vlgmr.msra.gmra.mxu0 %vm258_vm1, %v642_v10 }
  0x8a   : > { %v316_v17 = vpop.permute.xlu0 %315  ;;  %v322_v22 = vpop.permute.xlu1 %321 }
  0x8b   : > { %vm338_vm2 = vcmp.eq.s32.totalorder %v316_v17, %v313_v16  ;;  %vm340_vm5 = vcmp.eq.s32.totalorder %v322_v22, %v313_v16 }
  0x8c   : > { %v570_v18 = vsel %vm338_vm2, 1.0, %v651_v1  ;;  %v572_v30 = vsel %vm340_vm5, 1.0, %v651_v1 }
  0x8e   : > { %v319_v19 = vpop.permute.xlu0 %318  ;;  %v325_v23 = vpop.permute.xlu1 %324 }
  0x8f   : > { %vm339_vm3 = vcmp.eq.s32.totalorder %v319_v19, %v313_v16  ;;  %vm341_vm6 = vcmp.eq.s32.totalorder %v325_v23, %v313_v16 }
  0x90   : > { %v571_v20 = vsel %vm339_vm3, 1.0, %v651_v1  ;;  %v573_v31 = vsel %vm341_vm6, 1.0, %v651_v1 }
  0x91   : > { %v362_v21 = vpack.c.bf16 %v571_v20, %v570_v18  ;;  %v363_v37 = vpack.c.bf16 %v573_v31, %v572_v30 }
  0x92   : > { %v331_v25 = vpop.permute.xlu1 %330  ;;  %v328_v26 = vpop.permute.xlu0 %327 }
  0x93   : > { %616 = vmatprep.mubr.msk.bf16.mxu1 %vm366_vm4, %v362_v21  ;;  %vm343_vm7 = vcmp.eq.s32.totalorder %v331_v25, %v313_v16  ;;  %vm342_vm8 = vcmp.eq.s32.totalorder %v328_v26, %v313_v16 }
  0x94   : > { %v575_v33 = vsel %vm343_vm7, 1.0, %v651_v1  ;;  %v574_v34 = vsel %vm342_vm8, 1.0, %v651_v1 }
  0x95   : > { %v364_v38 = vpack.c.bf16 %v575_v33, %v574_v34 }
  0x96   : > { %v337_v35 = vpop.permute.xlu1 %336  ;;  %v334_v36 = vpop.permute.xlu0 %333 }
  0x97   : > { %vm345_vm9 = vcmp.eq.s32.totalorder %v337_v35, %v313_v16  ;;  %vm344_vm10 = vcmp.eq.s32.totalorder %v334_v36, %v313_v16 }
  0x98   : > { %v577_v39 = vsel %vm345_vm9, 1.0, %v651_v1  ;;  %v576_v40 = vsel %vm344_vm10, 1.0, %v651_v1 }
  0x99   : > { %v365_v41 = vpack.c.bf16 %v577_v39, %v576_v40 }
  0xdc   : > { %v296_v24 = vpop.f32.mrf.mxu0 }
  0xdd   : > { %452 = vrot.lane.b32.xlu0 %v296_v24, %s654_s7 }
  0xde   : > { %v612_v27 = vpop.f32.mrf.mxu0 }
  0xe0   : > { %v299_v28 = vpop.f32.mrf.mxu0 }
  0xe1   : > { %454 = vrot.lane.b32.xlu1 %v299_v28, %s654_s7  ;;  %v303_v29 = vpack.c.bf16 %v299_v28, %v296_v24 }
  0xe2   : > { %v613_v32 = vpop.f32.mrf.mxu0 }
  0xe3   : > { %614 = vmatprep.subr.bf16.mxu1 %v303_v29 }
  0xe4   : > { %615 = vmatpush3.bf16.msra.mxu1 %v303_v29 }
  0xe7   : > { %617 = vmatmul.mubr.msk.bf16.vlgmr.msra.gmra.mxu1 %vm366_vm4, %v363_v37 }
  0xe8   : > { %620 = vmatprep.mubr.msk.bf16.mxu1 %vm366_vm4, %v364_v38 }
  0xef   : > { %621 = vmatmul.mubr.msk.bf16.gmra.mxu1 %vm366_vm4, %v365_v41 }
 0x14f   : > { %v453_v53 = vpop.permute.xlu0 %452 }
 0x153   : > { %v455_v60 = vpop.permute.xlu1 %454 }
 0x1a7   : > { %v618_v42 = vpop.f32.mrf.mxu1 }
 0x1a9   : > { %v413_v43 = vpop.f32.mrf.mxu1 }
 0x1aa   : > { %v444_v47 = vmax.f32 %v413_v43, %v618_v42 }
 0x1ab   : > { %v619_v44 = vpop.f32.mrf.mxu1 }
 0x1ad   : > { %v416_v45 = vpop.f32.mrf.mxu1 }
 0x1ae   : > { %v445_v51 = vmax.f32 %v416_v45, %v619_v44 }
 0x1af   : > { %v622_v46 = vpop.f32.mrf.mxu1 }
 0x1b1   : > { %v429_v48 = vpop.f32.mrf.mxu1 }
 0x1b2   : > { %v446_v49 = vmax.f32 %v444_v47, %v429_v48 }
 0x1b3   : > { %v623_v50 = vpop.f32.mrf.mxu1 }
 0x1b4   : > { %v448_v52 = vmax.f32 %v446_v49, %v622_v46 }
 0x1b5   : > { %v432_v55 = vpop.f32.mrf.mxu1 }
 0x1b6   : > { %v458_v56 = vadd.f32 %v453_v53, %v448_v52  ;;  %v447_v57 = vmax.f32 %v445_v51, %v432_v55 }
 0x1b8   : > { %v467_v58 = vadd.f32 %v582_v54, %v458_v56  ;;  %v449_v59 = vmax.f32 %v447_v57, %v623_v50 }
 0x1ba   : > { %vm469_vm11 = vcmp.ge.f32.partialorder %v467_v58, 0.0  ;;  %v471_v61 = vmul.f32 0.2, %v467_v58  ;;  %v459_v62 = vadd.f32 %v455_v60, %v449_v59 }
 0x1bc   : > { %v473_v63 = vsel %vm469_vm11, %v467_v58, %v471_v61  ;;  %v468_v0 = vadd.f32 %v582_v54, %v459_v62 }
 0x1bd   : > { %v590_v1 = vpack.c.bf16 %v473_v63, %v473_v63 }
 0x1be   : > { %vm470_vm13 = vcmp.ge.f32.partialorder %v468_v0, 0.0  ;;  %v472_v2 = vmul.f32 0.2, %v468_v0 }
 0x1bf   : > { %484 = vst.msk [vmem:[%s217_s12] sm:$0xf] %vm483_vm12, %v590_v1 }
 0x1c0   : > { %v474_v3 = vsel %vm470_vm13, %v468_v0, %v472_v2 }
 0x1c1   : > { %v591_v4 = vpack.c.bf16 %v474_v3, %v474_v3 }
 0x1c3   : > { %485 = vst.msk [vmem:[%s217_s12 + $0x4] sm:$0xf] %vm483_vm12, %v591_v4 }
 0x1c4 PF: > { %s14_s15 = sadd.s32 1, %s649_s15  }
 0x1c5   : > { %p11_p4 = scmp.ge.s32.totalorder %s14_s15, 4  }
 0x1c7   :  { %13 = sbr.rel (!%p11_p4) target bundleno = 1 (0x1), region = 69 }

// kernel: dgcnn_forward.8
= control target key start
LH: loop header
LB: loop body
LE: loop exit
PB: predicated region body
PF: predicated region fallthrough
CT: control target
= control target key end

     0   :  { %s685_s15 = smov 0   ;;  %s744_s0 = inlined_call_operand.vmem [shape: s32[2,64,1], index: 0, kind: input, shape index: {}]   ;;  %s745_s1 = inlined_call_operand.vmem [shape: bf16[2,16,64], index: 1, kind: input, shape index: {}]   ;;  %s746_s2 = inlined_call_operand.vmem [shape: bf16[64,256], index: 2, kind: input, shape index: {}]   ;;  %s747_s3 = inlined_call_operand.vmem [shape: f32[1,128], index: 3, kind: input, shape index: {}]   ;;  %s748_s4 = inlined_call_operand.vmem [shape: bf16[2,16,128], index: 4, kind: output, shape index: {}]  }
   0x1 LB: > { %s562_s16 = sadd.s32 4294967295, %s656_s15   ;;  %p566_p0 = scmp.ge.s32.totalorder %s656_s15, 1  ;;  %s656_s15 = sphi %s685_s15, %s14_s15  }
   0x2   : > { %p172_p1 = scmp.lt.s32.totalorder %s656_s15, 3 }
   0x4   : > { %p173_p2 = pnand %p566_p0, %p172_p1 }
   0x5   : > { %p203_p3 = scmp.lt.s32.totalorder (!%p173_p2), %s562_s16, 1 }
   0x6   : > { %176 = sbr.rel (%p173_p2) target bundleno = 453 (0x1c5), region = 36 }
   0xb   : > { %v637_v0 = vld [vmem:[%s746_s2 + $0x34] ss:$8 sps:$4 sm:$0xff]   ;;  %v639_v1 = vld [vmem:[%s746_s2 + $0x30] ss:$8 sps:$4 sm:$0xff]   ;;  %v658_v2 = vmov 0   ;;  %s750_s16 = smov (!%p203_p3, %s562_s16), 1  ;;  %v330_v18 = vlaneseq }
   0xc   : > { %310 = vmatprep.mubr.bf16.mxu0 %v658_v2  ;;  %636 = vset.pattern.permute.xlu1 %v658_v2  ;;  %v640_v3 = vld [vmem:[%s746_s2 + $0x24] ss:$8 sps:$4 sm:$0xff]   ;;  %v642_v4 = vld [vmem:[%s746_s2 + $0x20] ss:$8 sps:$4 sm:$0xff]   ;;  %v643_v5 = vld [vmem:[%s746_s2 + $0x14] ss:$8 sps:$4 sm:$0xff]  }
   0xd   : > { %286 = vmatprep.subr.bf16.mxu0 %v637_v0  ;;  %635 = vset.pattern.permute.xlu0 %v658_v2  ;;  %s600_s27 = sshll.u32 %s750_s16, 6  ;;  %s601_s28 = sshll.u32 %s750_s16, 3  ;;  %v645_v6 = vld [vmem:[%s746_s2 + $0x10] ss:$8 sps:$4 sm:$0xff]   ;;  %v646_v9 = vld [vmem:[%s746_s2 + $0x4] ss:$8 sps:$4 sm:$0xff]  }
   0xe   : > { %287 = vmatpush1.bf16.msra.mxu0 %v639_v1  ;;  %s207_s5 = scalar_lea.vmem %s744_s0, %s600_s27  ;;  %s212_s8 = scalar_lea.vmem %s745_s1, %s601_s28  ;;  %v648_v12 = vld [vmem:[%s746_s2] ss:$8 sps:$4 sm:$0xff]   ;;  %vm274_vm0 = vcmask 523264   ;;  %v331_v19 = vand.u32 127, %v330_v18  ;;  %v659_v22 = vmov 0.0   ;;  %vm384_vm5 = vcmask 130048  }
   0xf   : > { %288 = vmatprep.subr.bf16.mxu0 %v640_v3  ;;  %v324_v7 = vld [vmem:[%s207_s5 + $0x10] sm:$0xff]  ;;  %v322_v8 = vld [vmem:[%s207_s5] sm:$0xff]  ;;  %v325_v10 = vld [vmem:[%s207_s5 + $0x18] sm:$0xff]  ;;  %s217_s21 = scalar_lea.vmem %s748_s4, %s601_s28 }
  0x10   : > { %339 = vperm.xlu1 %636, %v324_v7   ;;  %333 = vperm.xlu0 %635, %v322_v8   ;;  %v323_v11 = vld [vmem:[%s207_s5 + $0x8] sm:$0xff]  ;;  %v649_v14 = vld [vmem:[%s212_s8] sm:$0xff]   ;;  %v329_v16 = vld [vmem:[%s207_s5 + $0x38] sm:$0xff] }
  0x11   : > { %v327_v13 = vld [vmem:[%s207_s5 + $0x28] sm:$0xff]  ;;  %v326_v15 = vld [vmem:[%s207_s5 + $0x20] sm:$0xff]  ;;  %v328_v17 = vld [vmem:[%s207_s5 + $0x30] sm:$0xff] }
  0x12   : > { %289 = vmatpush1.bf16.msra.mxu0 %v642_v4  ;;  %v595_v56 = vld [vmem:[%s747_s3] ss:$0 sm:$0xff] }
  0x13   : > { %290 = vmatprep.subr.bf16.mxu0 %v643_v5 }
  0x14   : > { %342 = vperm.xlu1 %636, %v325_v10   ;;  %336 = vperm.xlu0 %635, %v323_v11  }
  0x16   : > { %291 = vmatpush1.bf16.msra.mxu0 %v645_v6 }
  0x17   : > { %292 = vmatprep.subr.bf16.mxu0 %v646_v9 }
  0x18   : > { %348 = vperm.xlu1 %636, %v327_v13   ;;  %345 = vperm.xlu0 %635, %v326_v15  }
  0x1a   : > { %293 = vmatpush1.bf16.msra.mxu0 %v648_v12 }
  0x1c   : > { %354 = vperm.xlu1 %636, %v329_v16   ;;  %351 = vperm.xlu0 %635, %v328_v17  }
  0x1d   : > { %582 = vmatmul.mubr.msk.bf16.vlgmr.msra.gmra.mxu0 %vm274_vm0, %v649_v14 }
  0x8b   : > { %v340_v20 = vpop.permute.xlu1 %339  ;;  %v334_v21 = vpop.permute.xlu0 %333 }
  0x8c   : > { %vm358_vm1 = vcmp.eq.s32.totalorder %v340_v20, %v331_v19  ;;  %vm356_vm2 = vcmp.eq.s32.totalorder %v334_v21, %v331_v19 }
  0x8d   : > { %v585_v23 = vsel %vm358_vm1, 1.0, %v659_v22  ;;  %v583_v25 = vsel %vm356_vm2, 1.0, %v659_v22 }
  0x8f   : > { %v343_v24 = vpop.permute.xlu1 %342  ;;  %v337_v26 = vpop.permute.xlu0 %336 }
  0x90   : > { %vm359_vm3 = vcmp.eq.s32.totalorder %v343_v24, %v331_v19  ;;  %vm357_vm4 = vcmp.eq.s32.totalorder %v337_v26, %v331_v19 }
  0x91   : > { %v586_v27 = vsel %vm359_vm3, 1.0, %v659_v22  ;;  %v584_v29 = vsel %vm357_vm4, 1.0, %v659_v22 }
  0x92   : > { %v381_v28 = vpack.c.bf16 %v586_v27, %v585_v23  ;;  %v380_v31 = vpack.c.bf16 %v584_v29, %v583_v25 }
  0x93   : > { %v349_v30 = vpop.permute.xlu1 %348  ;;  %v346_v32 = vpop.permute.xlu0 %345 }
  0x94   : > { %vm361_vm6 = vcmp.eq.s32.totalorder %v349_v30, %v331_v19  ;;  %vm360_vm7 = vcmp.eq.s32.totalorder %v346_v32, %v331_v19  ;;  %617 = vmatprep.mubr.msk.bf16.mxu1 %vm384_vm5, %v380_v31 }
  0x95   : > { %v588_v33 = vsel %vm361_vm6, 1.0, %v659_v22  ;;  %v587_v34 = vsel %vm360_vm7, 1.0, %v659_v22 }
  0x96   : > { %v382_v35 = vpack.c.bf16 %v588_v33, %v587_v34 }
  0x97   : > { %v355_v36 = vpop.permute.xlu1 %354  ;;  %v352_v37 = vpop.permute.xlu0 %351 }
  0x98   : > { %vm363_vm8 = vcmp.eq.s32.totalorder %v355_v36, %v331_v19  ;;  %vm362_vm9 = vcmp.eq.s32.totalorder %v352_v37, %v331_v19 }
  0x99   : > { %v590_v38 = vsel %vm363_vm8, 1.0, %v659_v22  ;;  %v589_v39 = vsel %vm362_vm9, 1.0, %v659_v22 }
  0x9a   : > { %v383_v40 = vpack.c.bf16 %v590_v38, %v589_v39 }
  0xdd   : > { %v312_v41 = vpop.f32.mrf.mxu0 }
  0xdf   : > { %v314_v42 = vpop.f32.mrf.mxu0 }
  0xe1   : > { %v316_v43 = vpop.f32.mrf.mxu0 }
  0xe2   : > { %v321_v44 = vpack.c.bf16 %v316_v43, %v312_v41 }
  0xe3   : > { %v318_v62 = vpop.f32.mrf.mxu0 }
  0xe4   : > { %615 = vmatprep.subr.bf16.mxu1 %v321_v44 }
  0xe5   : > { %616 = vmatpush3.bf16.msra.mxu1 %v321_v44 }
  0xe8   : > { %618 = vmatmul.mubr.msk.bf16.vlgmr.msra.gmra.mxu1 %vm384_vm5, %v381_v28 }
  0xe9   : > { %621 = vmatprep.mubr.msk.bf16.mxu1 %vm384_vm5, %v382_v35 }
  0xf0   : > { %622 = vmatmul.mubr.msk.bf16.gmra.mxu1 %vm384_vm5, %v383_v40 }
 0x1a8   : > { %v619_v45 = vpop.f32.mrf.mxu1 }
 0x1aa   : > { %v431_v46 = vpop.f32.mrf.mxu1 }
 0x1ab   : > { %v462_v50 = vmax.f32 %v431_v46, %v619_v45 }
 0x1ac   : > { %v620_v47 = vpop.f32.mrf.mxu1 }
 0x1ae   : > { %v434_v48 = vpop.f32.mrf.mxu1 }
 0x1af   : > { %v463_v54 = vmax.f32 %v434_v48, %v620_v47 }
 0x1b0   : > { %v623_v49 = vpop.f32.mrf.mxu1 }
 0x1b2   : > { %v447_v51 = vpop.f32.mrf.mxu1 }
 0x1b3   : > { %v464_v52 = vmax.f32 %v462_v50, %v447_v51 }
 0x1b4   : > { %v624_v53 = vpop.f32.mrf.mxu1 }
 0x1b5   : > { %v466_v55 = vmax.f32 %v464_v52, %v623_v49 }
 0x1b6   : > { %v450_v57 = vpop.f32.mrf.mxu1 }
 0x1b7   : > { %v468_v58 = vadd.f32 %v466_v55, %v314_v42  ;;  %v465_v59 = vmax.f32 %v463_v54, %v450_v57 }
 0x1b9   : > { %v477_v60 = vadd.f32 %v595_v56, %v468_v58  ;;  %v467_v61 = vmax.f32 %v465_v59, %v624_v53 }
 0x1bb   : > { %v469_v63 = vadd.f32 %v467_v61, %v318_v62  ;;  %v481_v0 = vmul.f32 0.2, %v477_v60  ;;  %vm479_vm10 = vcmp.ge.f32.partialorder %v477_v60, 0.0 }
 0x1bd   : > { %v478_v1 = vadd.f32 %v595_v56, %v469_v63  ;;  %v483_v3 = vsel %vm479_vm10, %v477_v60, %v481_v0 }
 0x1bf   : > { %vm480_vm11 = vcmp.ge.f32.partialorder %v478_v1, 0.0  ;;  %v482_v2 = vmul.f32 0.2, %v478_v1 }
 0x1c1   : > { %v484_v4 = vsel %vm480_vm11, %v478_v1, %v482_v2 }
 0x1c2   : > { %v608_v5 = vpack.c.bf16 %v484_v4, %v483_v3 }
 0x1c4   : > { %609 = vst [vmem:[%s217_s21] sm:$0xff] %v608_v5  }
 0x1c5 PF: > { %s14_s15 = sadd.s32 1, %s656_s15  }
 0x1c6   : > { %p11_p4 = scmp.ge.s32.totalorder %s14_s15, 4  }
 0x1c8   :  { %13 = sbr.rel (!%p11_p4) target bundleno = 1 (0x1), region = 69 }

// kernel: dgcnn_forward.9
= control target key start
LH: loop header
LB: loop body
LE: loop exit
PB: predicated region body
PF: predicated region fallthrough
CT: control target
= control target key end

     0   :  { %s943_s15 = smov 0   ;;  %s1092_s0 = inlined_call_operand.vmem [shape: s32[2,64,1], index: 0, kind: input, shape index: {}]   ;;  %s1093_s1 = inlined_call_operand.vmem [shape: bf16[2,16,128], index: 1, kind: input, shape index: {}]   ;;  %s1094_s2 = inlined_call_operand.vmem [shape: bf16[128,512], index: 2, kind: input, shape index: {}]   ;;  %s1095_s3 = inlined_call_operand.vmem [shape: f32[1,256], index: 3, kind: input, shape index: {}]   ;;  %s1096_s4 = inlined_call_operand.vmem [shape: bf16[2,16,256], index: 4, kind: output, shape index: {}]  }
   0x1 LB: > { %s780_s16 = sadd.s32 4294967295, %s914_s15   ;;  %p784_p0 = scmp.ge.s32.totalorder %s914_s15, 1  ;;  %s914_s15 = sphi %s943_s15, %s14_s15  }
   0x2   : > { %p172_p1 = scmp.lt.s32.totalorder %s914_s15, 3 }
   0x4   : > { %p173_p2 = pnand %p784_p0, %p172_p1 }
   0x5   : > { %p203_p3 = scmp.lt.s32.totalorder (!%p173_p2), %s780_s16, 1 }
   0x6   : > { %176 = sbr.rel (%p173_p2) target bundleno = 474 (0x1da), region = 36 }
   0xb   : > { %v859_v0 = vld [vmem:[%s1094_s2 + $0xe4] ss:$16 sps:$4 sm:$0xff]   ;;  %v861_v1 = vld [vmem:[%s1094_s2 + $0xe0] ss:$16 sps:$4 sm:$0xff]   ;;  %v916_v2 = vmov 0   ;;  %s1098_s16 = smov (!%p203_p3, %s780_s16), 1  ;;  %v515_v44 = vlaneseq }
   0xc   : > { %451 = vmatprep.mubr.bf16.mxu0 %v916_v2  ;;  %858 = vset.pattern.permute.xlu1 %v916_v2  ;;  %v862_v3 = vld [vmem:[%s1094_s2 + $0xc4] ss:$16 sps:$4 sm:$0xff]   ;;  %v864_v4 = vld [vmem:[%s1094_s2 + $0xc0] ss:$16 sps:$4 sm:$0xff]   ;;  %s840_s27 = sshll.u32 %s1098_s16, 6  ;;  %s841_s28 = sshll.u32 %s1098_s16, 3 }
   0xd   : > { %419 = vmatprep.subr.bf16.mxu0 %v859_v0  ;;  %857 = vset.pattern.permute.xlu0 %v916_v2  ;;  %v865_v5 = vld [vmem:[%s1094_s2 + $0xa4] ss:$16 sps:$4 sm:$0xff]   ;;  %v867_v6 = vld [vmem:[%s1094_s2 + $0xa0] ss:$16 sps:$4 sm:$0xff]   ;;  %s983_s9 = scalar_lea.vmem %s1092_s0, %s840_s27  ;;  %s988_s12 = scalar_lea.vmem %s1093_s1, %s841_s28  ;;  %v884_v16 = vld [vmem:[%s1094_s2 + $0xec] ss:$16 sps:$4 sm:$0xff]  }
   0xe   : > { %420 = vmatpush1.bf16.msra.mxu0 %v861_v1  ;;  %494 = vmatprep.mubr.bf16.mxu1 %v916_v2  ;;  %v868_v7 = vld [vmem:[%s1094_s2 + $0x84] ss:$16 sps:$4 sm:$0xff]   ;;  %v870_v8 = vld [vmem:[%s1094_s2 + $0x80] ss:$16 sps:$4 sm:$0xff]   ;;  %v512_v13 = vld [vmem:[%s983_s9 + $0x28] sm:$0xff]  ;;  %v516_v48 = vand.u32 127, %v515_v44 }
   0xf   : > { %421 = vmatprep.subr.bf16.mxu0 %v862_v3  ;;  %v511_v9 = vld [vmem:[%s983_s9 + $0x20] sm:$0xff]  ;;  %v508_v15 = vld [vmem:[%s983_s9 + $0x8] sm:$0xff]  ;;  %v510_v18 = vld [vmem:[%s983_s9 + $0x18] sm:$0xff]  ;;  %462 = vmatprep.subr.bf16.mxu1 %v884_v16  ;;  %v917_v53 = vmov 0.0   ;;  %vm569_vm4 = vcmask 130048   ;;  %s842_s21 = sshll.u32 %s1098_s16, 4 }
  0x10   : > { %v871_v10 = vld [vmem:[%s1094_s2 + $0x64] ss:$16 sps:$4 sm:$0xff]   ;;  %530 = vperm.xlu1 %858, %v511_v9   ;;  %v873_v12 = vld [vmem:[%s1094_s2 + $0x60] ss:$16 sps:$4 sm:$0xff]   ;;  %v886_v17 = vld [vmem:[%s1094_s2 + $0xe8] ss:$16 sps:$4 sm:$0xff]   ;;  %s217_s23 = scalar_lea.vmem %s1096_s4, %s842_s21 }
  0x11   : > { %v507_v11 = vld [vmem:[%s983_s9] sm:$0xff]  ;;  %v887_v19 = vld [vmem:[%s1094_s2 + $0xcc] ss:$16 sps:$4 sm:$0xff]   ;;  %v509_v20 = vld [vmem:[%s983_s9 + $0x10] sm:$0xff]  ;;  %463 = vmatpush1.bf16.msra.mxu1 %v886_v17  ;;  %v674_v17 = vshrl.u32 %v515_v44, 7 }
  0x12   : > { %422 = vmatpush1.bf16.msra.mxu0 %v864_v4  ;;  %518 = vperm.xlu0 %857, %v507_v11   ;;  %v874_v14 = vld [vmem:[%s1094_s2 + $0x44] ss:$16 sps:$4 sm:$0xff]   ;;  %v889_v21 = vld [vmem:[%s1094_s2 + $0xc8] ss:$16 sps:$4 sm:$0xff]   ;;  %v876_v22 = vld [vmem:[%s1094_s2 + $0x40] ss:$16 sps:$4 sm:$0xff]  }
  0x13   : > { %423 = vmatprep.subr.bf16.mxu0 %v865_v5  ;;  %464 = vmatprep.subr.bf16.mxu1 %v887_v19  ;;  %v890_v23 = vld [vmem:[%s1094_s2 + $0xac] ss:$16 sps:$4 sm:$0xff]   ;;  %v877_v24 = vld [vmem:[%s1094_s2 + $0x24] ss:$16 sps:$4 sm:$0xff]   ;;  %v892_v27 = vld [vmem:[%s1094_s2 + $0xa8] ss:$16 sps:$4 sm:$0xff]  }
  0x14   : > { %533 = vperm.xlu1 %858, %v512_v13   ;;  %v514_v25 = vld [vmem:[%s983_s9 + $0x38] sm:$0xff]  ;;  %v513_v26 = vld [vmem:[%s983_s9 + $0x30] sm:$0xff]  ;;  %v883_v34 = vld [vmem:[%s988_s12] sm:$0xff]  }
  0x15   : > { %465 = vmatpush1.bf16.msra.mxu1 %v889_v21  ;;  %v879_v28 = vld [vmem:[%s1094_s2 + $0x20] ss:$16 sps:$4 sm:$0xff]   ;;  %v893_v29 = vld [vmem:[%s1094_s2 + $0x8c] ss:$16 sps:$4 sm:$0xff]   ;;  %v880_v30 = vld [vmem:[%s1094_s2 + $0x4] ss:$16 sps:$4 sm:$0xff]  }
  0x16   : > { %424 = vmatpush1.bf16.msra.mxu0 %v867_v6  ;;  %521 = vperm.xlu0 %857, %v508_v15   ;;  %v895_v31 = vld [vmem:[%s1094_s2 + $0x88] ss:$16 sps:$4 sm:$0xff]   ;;  %v882_v32 = vld [vmem:[%s1094_s2] ss:$16 sps:$4 sm:$0xff]   ;;  %v896_v33 = vld [vmem:[%s1094_s2 + $0x6c] ss:$16 sps:$4 sm:$0xff]  }
  0x17   : > { %425 = vmatprep.subr.bf16.mxu0 %v868_v7  ;;  %466 = vmatprep.subr.bf16.mxu1 %v890_v23  ;;  %v898_v35 = vld [vmem:[%s1094_s2 + $0x68] ss:$16 sps:$4 sm:$0xff]   ;;  %v899_v36 = vld [vmem:[%s1094_s2 + $0x4c] ss:$16 sps:$4 sm:$0xff]   ;;  %v675_v23 = vsub.s32 0, %v674_v17 }
  0x18   : > { %527 = vperm.xlu1 %858, %v510_v18   ;;  %v901_v37 = vld [vmem:[%s1094_s2 + $0x48] ss:$16 sps:$4 sm:$0xff]   ;;  %v902_v38 = vld [vmem:[%s1094_s2 + $0x2c] ss:$16 sps:$4 sm:$0xff]  }
  0x19   : > { %467 = vmatpush1.bf16.msra.mxu1 %v892_v27  ;;  %v904_v39 = vld [vmem:[%s1094_s2 + $0x28] ss:$16 sps:$4 sm:$0xff]   ;;  %v905_v40 = vld [vmem:[%s1094_s2 + $0xc] ss:$16 sps:$4 sm:$0xff]  }
  0x1a   : > { %426 = vmatpush1.bf16.msra.mxu0 %v870_v8  ;;  %524 = vperm.xlu0 %857, %v509_v20   ;;  %v907_v41 = vld [vmem:[%s1094_s2 + $0x8] ss:$16 sps:$4 sm:$0xff]  }
  0x1b   : > { %427 = vmatprep.subr.bf16.mxu0 %v871_v10  ;;  %468 = vmatprep.subr.bf16.mxu1 %v893_v29 }
  0x1c   : > { %539 = vperm.xlu1 %858, %v514_v25  }
  0x1d   : > { %469 = vmatpush1.bf16.msra.mxu1 %v895_v31 }
  0x1e   : > { %428 = vmatpush1.bf16.msra.mxu0 %v873_v12  ;;  %536 = vperm.xlu0 %857, %v513_v26   ;;  %v679_v26 = vsub.s32 1, %v674_v17 }
  0x1f   : > { %429 = vmatprep.subr.bf16.mxu0 %v874_v14  ;;  %470 = vmatprep.subr.bf16.mxu1 %v896_v33 }
  0x21   : > { %471 = vmatpush1.bf16.msra.mxu1 %v898_v35 }
  0x22   : > { %430 = vmatpush1.bf16.msra.mxu0 %v876_v22  ;;  %472 = vmatprep.subr.bf16.mxu1 %v899_v36 }
  0x23   : > { %431 = vmatprep.subr.bf16.mxu0 %v877_v24  ;;  %v671_v24 = vld [vmem:[%s1095_s3] sm:$0x3] }
  0x24   : > { %v680_v35 = vrot.slane %v671_v24, %v679_v26 }
  0x25   : > { %473 = vmatpush1.bf16.msra.mxu1 %v901_v37 }
  0x26   : > { %432 = vmatpush1.bf16.msra.mxu0 %v879_v28  ;;  %474 = vmatprep.subr.bf16.mxu1 %v902_v38 }
  0x27   : > { %433 = vmatprep.subr.bf16.mxu0 %v880_v30 }
  0x29   : > { %475 = vmatpush1.bf16.msra.mxu1 %v904_v39 }
  0x2a   : > { %434 = vmatpush1.bf16.msra.mxu0 %v882_v32  ;;  %476 = vmatprep.subr.bf16.mxu1 %v905_v40  ;;  %v676_v32 = vrot.slane %v671_v24, %v675_v23 }
  0x2d   : > { %452 = vmatmul.mubr.bf16.vlgmr.msra.gmra.mxu0 %v883_v34  ;;  %477 = vmatpush1.bf16.msra.mxu1 %v907_v41 }
  0x2e   : > { %614 = vmatprep.mubr.bf16.mxu0 %v916_v2 }
  0x30   : > { %495 = vmatmul.mubr.bf16.vlgmr.msra.gmra.mxu1 %v883_v34 }
  0x31   : > { %634 = vmatprep.mubr.bf16.mxu1 %v916_v2 }
  0x8b   : > { %v531_v42 = vpop.permute.xlu1 %530 }
  0x8c   : > { %vm545_vm0 = vcmp.eq.s32.totalorder %v531_v42, %v516_v48 }
  0x8d   : > { %v519_v43 = vpop.permute.xlu0 %518  ;;  %v828_v54 = vsel %vm545_vm0, 1.0, %v917_v53 }
  0x8e   : > { %vm541_vm2 = vcmp.eq.s32.totalorder %v519_v43, %v516_v48 }
  0x8f   : > { %v534_v45 = vpop.permute.xlu1 %533  ;;  %v824_v58 = vsel %vm541_vm2, 1.0, %v917_v53 }
  0x90   : > { %vm546_vm1 = vcmp.eq.s32.totalorder %v534_v45, %v516_v48 }
  0x91   : > { %v522_v46 = vpop.permute.xlu0 %521  ;;  %v829_v55 = vsel %vm546_vm1, 1.0, %v917_v53 }
  0x92   : > { %vm542_vm3 = vcmp.eq.s32.totalorder %v522_v46, %v516_v48  ;;  %v567_v61 = vpack.c.bf16 %v829_v55, %v828_v54 }
  0x93   : > { %v528_v50 = vpop.permute.xlu1 %527  ;;  %v825_v59 = vsel %vm542_vm3, 1.0, %v917_v53 }
  0x94   : > { %v565_v0 = vpack.c.bf16 %v825_v59, %v824_v58  ;;  %vm544_vm5 = vcmp.eq.s32.totalorder %v528_v50, %v516_v48 }
  0x95   : > { %v525_v52 = vpop.permute.xlu0 %524  ;;  %v827_v1 = vsel %vm544_vm5, 1.0, %v917_v53 }
  0x96   : > { %vm543_vm6 = vcmp.eq.s32.totalorder %v525_v52, %v516_v48 }
  0x97   : > { %v540_v62 = vpop.permute.xlu1 %539  ;;  %v826_v3 = vsel %vm543_vm6, 1.0, %v917_v53 }
  0x98   : > { %vm548_vm7 = vcmp.eq.s32.totalorder %v540_v62, %v516_v48  ;;  %v566_v6 = vpack.c.bf16 %v827_v1, %v826_v3 }
  0x99   : > { %v537_v63 = vpop.permute.xlu0 %536  ;;  %v831_v4 = vsel %vm548_vm7, 1.0, %v917_v53 }
  0x9a   : > { %vm547_vm8 = vcmp.eq.s32.totalorder %v537_v63, %v516_v48 }
  0x9b   : > { %v830_v5 = vsel %vm547_vm8, 1.0, %v917_v53 }
  0x9c   : > { %v568_v7 = vpack.c.bf16 %v831_v4, %v830_v5 }
  0xed   : > { %v453_v47 = vpop.f32.mrf.mxu0 }
  0xef   : > { %v455_v49 = vpop.f32.mrf.mxu0 }
  0xf0   : > { %v496_v8 = vpop.f32.mrf.mxu1 }
  0xf1   : > { %v457_v51 = vpop.f32.mrf.mxu0 }
  0xf2   : > { %v505_v60 = vpack.c.bf16 %v457_v51, %v453_v47  ;;  %v498_v9 = vpop.f32.mrf.mxu1 }
  0xf3   : > { %v459_v56 = vpop.f32.mrf.mxu0 }
  0xf4   : > { %v506_v57 = vpack.c.bf16 %v459_v56, %v455_v49  ;;  %v500_v10 = vpop.f32.mrf.mxu1 }
  0xf6   : > { %596 = vmatprep.subr.bf16.mxu0 %v506_v57  ;;  %845 = vmatprep.subr.bf16.mxu1 %v506_v57  ;;  %v502_v11 = vpop.f32.mrf.mxu1 }
  0xf7   : > { %597 = vmatpush1.bf16.msra.mxu0 %v505_v60  ;;  %846 = vmatpush1.bf16.msra.mxu1 %v505_v60 }
  0xfa   : > { %832 = vmatmul.mubr.msk.bf16.vlgmr.msra.gmra.mxu0 %vm569_vm4, %v565_v0  ;;  %834 = vmatmul.mubr.msk.bf16.vlgmr.msra.gmra.mxu1 %vm569_vm4, %v567_v61 }
  0xfb   : > { %624 = vmatprep.mubr.bf16.mxu0 %v916_v2  ;;  %644 = vmatprep.mubr.bf16.mxu1 %v916_v2 }
 0x102   : > { %833 = vmatmul.mubr.msk.bf16.gmra.mxu0 %vm569_vm4, %v566_v6  ;;  %835 = vmatmul.mubr.msk.bf16.gmra.mxu1 %vm569_vm4, %v568_v7 }
 0x1ba   : > { %v616_v12 = vpop.f32.mrf.mxu0  ;;  %v636_v13 = vpop.f32.mrf.mxu1 }
 0x1bc   : > { %v618_v14 = vpop.f32.mrf.mxu0  ;;  %v638_v15 = vpop.f32.mrf.mxu1 }
 0x1be   : > { %v620_v16 = vpop.f32.mrf.mxu0  ;;  %v640_v2 = vpop.f32.mrf.mxu1 }
 0x1c0   : > { %v622_v18 = vpop.f32.mrf.mxu0  ;;  %v642_v19 = vpop.f32.mrf.mxu1 }
 0x1c2   : > { %v626_v20 = vpop.f32.mrf.mxu0  ;;  %v646_v21 = vpop.f32.mrf.mxu1 }
 0x1c3   : > { %v655_v22 = vmax.f32 %v616_v12, %v626_v20 }
 0x1c4   : > { %v628_v25 = vpop.f32.mrf.mxu0  ;;  %v648_v29 = vpop.f32.mrf.mxu1 }
 0x1c5   : > { %v659_v27 = vmax.f32 %v655_v22, %v636_v13  ;;  %v656_v28 = vmax.f32 %v618_v14, %v628_v25 }
 0x1c6   : > { %v630_v30 = vpop.f32.mrf.mxu0  ;;  %v650_v39 = vpop.f32.mrf.mxu1 }
 0x1c7   : > { %v663_v31 = vmax.f32 %v659_v27, %v646_v21  ;;  %v660_v33 = vmax.f32 %v656_v28, %v638_v15  ;;  %v657_v34 = vmax.f32 %v620_v16, %v630_v30 }
 0x1c8   : > { %v632_v36 = vpop.f32.mrf.mxu0  ;;  %v652_v49 = vpop.f32.mrf.mxu1 }
 0x1c9   : > { %v667_v37 = vadd.f32 %v663_v31, %v496_v8  ;;  %v664_v38 = vmax.f32 %v660_v33, %v648_v29  ;;  %v661_v40 = vmax.f32 %v657_v34, %v640_v2  ;;  %v658_v41 = vmax.f32 %v622_v18, %v632_v36 }
 0x1cb   : > { %v683_v42 = vadd.f32 %v676_v32, %v667_v37  ;;  %v668_v43 = vadd.f32 %v664_v38, %v498_v9  ;;  %v665_v44 = vmax.f32 %v661_v40, %v650_v39  ;;  %v662_v45 = vmax.f32 %v658_v41, %v642_v19 }
 0x1cd   : > { %v691_v46 = vmul.f32 0.2, %v683_v42  ;;  %v684_v47 = vadd.f32 %v680_v35, %v668_v43  ;;  %v669_v48 = vadd.f32 %v665_v44, %v500_v10  ;;  %vm687_vm9 = vcmp.ge.f32.partialorder %v683_v42, 0.0 }
 0x1ce   : > { %v666_v50 = vmax.f32 %v662_v45, %v652_v49 }
 0x1cf   : > { %vm688_vm10 = vcmp.ge.f32.partialorder %v684_v47, 0.0  ;;  %v692_v51 = vmul.f32 0.2, %v684_v47  ;;  %v685_v52 = vadd.f32 %v676_v32, %v669_v48  ;;  %v695_v54 = vsel %vm687_vm9, %v683_v42, %v691_v46 }
 0x1d0   : > { %v670_v53 = vadd.f32 %v666_v50, %v502_v11 }
 0x1d1   : > { %v696_v55 = vsel %vm688_vm10, %v684_v47, %v692_v51  ;;  %v693_v57 = vmul.f32 0.2, %v685_v52  ;;  %vm689_vm11 = vcmp.ge.f32.partialorder %v685_v52, 0.0 }
 0x1d2   : > { %v843_v56 = vpack.c.bf16 %v696_v55, %v695_v54  ;;  %v686_v58 = vadd.f32 %v680_v35, %v670_v53 }
 0x1d3   : > { %v697_v60 = vsel %vm689_vm11, %v685_v52, %v693_v57 }
 0x1d4   : > { %711 = vst [vmem:[%s217_s23] sm:$0xff] %v843_v56  ;;  %vm690_vm12 = vcmp.ge.f32.partialorder %v686_v58, 0.0  ;;  %v694_v59 = vmul.f32 0.2, %v686_v58 }
 0x1d6   : > { %v698_v61 = vsel %vm690_vm12, %v686_v58, %v694_v59 }
 0x1d7   : > { %v844_v62 = vpack.c.bf16 %v698_v61, %v697_v60 }
 0x1d9   : > { %712 = vst [vmem:[%s217_s23 + $0x8] sm:$0xff] %v844_v62 }
 0x1da PF: > { %s14_s15 = sadd.s32 1, %s914_s15  }
 0x1db   : > { %p11_p4 = scmp.ge.s32.totalorder %s14_s15, 4  }
 0x1dd   :  { %13 = sbr.rel (!%p11_p4) target bundleno = 1 (0x1), region = 69 }

// kernel: dgcnn_forward.10
= control target key start
LH: loop header
LB: loop body
LE: loop exit
PB: predicated region body
PF: predicated region fallthrough
CT: control target
= control target key end

     0   :  { %s1294_s13 = smov 0   ;;  %s1461_s0 = inlined_call_operand.vmem [shape: bf16[2,16,64], index: 0, kind: input, shape index: {}]   ;;  %s1462_s1 = inlined_call_operand.vmem [shape: bf16[2,16,64], index: 1, kind: input, shape index: {}]   ;;  %s1463_s2 = inlined_call_operand.vmem [shape: bf16[2,16,128], index: 2, kind: input, shape index: {}]   ;;  %s1464_s3 = inlined_call_operand.vmem [shape: bf16[2,16,256], index: 3, kind: input, shape index: {}]   ;;  %s1465_s4 = inlined_call_operand.vmem [shape: bf16[64,64], index: 4, kind: input, shape index: {}]   ;;  %s1466_s5 = inlined_call_operand.vmem [shape: bf16[64,64], index: 5, kind: input, shape index: {}]   ;;  %s1467_s6 = inlined_call_operand.vmem [shape: bf16[128,64], index: 6, kind: input, shape index: {}]   ;;  %s1468_s7 = inlined_call_operand.vmem [shape: bf16[256,64], index: 7, kind: input, shape index: {}]   ;;  %s1469_s8 = inlined_call_operand.vmem [shape: f32[1,64], index: 8, kind: input, shape index: {}]   ;;  %s1470_s9 = inlined_call_operand.vmem [shape: f32[2,1,64], index: 9, kind: output, shape index: {0}]   ;;  %s1471_s10 = inlined_call_operand.vmem [shape: f32[2,1,64], index: 10, kind: output, shape index: {1}]  }
   0x1 LB: > { %s1037_s14 = sadd.s32 4294967295, %s1235_s13   ;;  %p1041_p0 = scmp.ge.s32.totalorder %s1235_s13, 1  ;;  %s1235_s13 = sphi %s1294_s13, %s21_s13  }
   0x2   : > { %p345_p1 = scmp.lt.s32.totalorder %s1235_s13, 3 }
   0x4   : > { %p346_p2 = pnand %p1041_p0, %p345_p1 }
   0x5   : > { %p399_p3 = scmp.lt.s32.totalorder (!%p346_p2), %s1037_s14, 1 }
   0x6   : > { %349 = sbr.rel (%p346_p2) target bundleno = 287 (0x11f), region = 56 }
   0xb   : > { %v1191_v0 = vld [vmem:[%s1466_s5 + $0x18] sm:$0xff]   ;;  %v1237_v1 = vmov 0.0   ;;  %v1193_v3 = vld [vmem:[%s1466_s5 + $0x10] sm:$0xff]   ;;  %vm1238_vm0 = vmmov 0   ;;  %s1473_s14 = smov (!%p399_p3, %s1037_s14), 1  ;;  %v1195_v5 = vld [vmem:[%s1466_s5 + $0x8] sm:$0xff]  }
   0xc   : > { %1137 = vmatprep.subr.bf16.mxu0 %v1237_v1  ;;  %1149 = vmatprep.subr.bf16.mxu1 %v1237_v1  ;;  %v1192_v2 = vld [vmem:[%s1465_s4 + $0x18] sm:$0xff]   ;;  %v1194_v4 = vld [vmem:[%s1465_s4 + $0x10] sm:$0xff]   ;;  %s1328_s25 = sshll.u32 %s1473_s14, 3  ;;  %v1196_v6 = vld [vmem:[%s1465_s4 + $0x8] sm:$0xff]   ;;  %vm475_vm1 = vcmask 523264   ;;  %s421_s28 = scalar_lea.vmem %s1470_s9, %s1473_s14  ;;  %vm915_vm4 = vcmask 516096  }
   0xd   : > { %1138 = vmatpush3.bf16.msra.mxu0 %v1191_v0  ;;  %1145 = vmatprep.mubr.msk.bf16.mxu0 %vm1238_vm0, %v1237_v1  ;;  %s408_s30 = scalar_lea.vmem %s1462_s1, %s1328_s25  ;;  %s403_s15 = scalar_lea.vmem %s1461_s0, %s1328_s25  ;;  %v1197_v7 = vld [vmem:[%s1466_s5] sm:$0xff]   ;;  %v1201_v10 = vld [vmem:[%s1468_s7 + $0x78] sm:$0xff]   ;;  %v1204_v14 = vld [vmem:[%s1468_s7 + $0x70] sm:$0xff]  }
   0xe   : > { %1150 = vmatpush3.bf16.msra.mxu1 %v1192_v2  ;;  %1139 = vmatprep.subr.bf16.mxu0 %v1237_v1  ;;  %v1198_v8 = vld [vmem:[%s1465_s4] sm:$0xff]   ;;  %v1202_v12 = vld [vmem:[%s1467_s6 + $0x38] sm:$0xff]   ;;  %v1205_v15 = vld [vmem:[%s1467_s6 + $0x30] sm:$0xff]   ;;  %s413_s29 = scalar_lea.vmem %s1463_s2, %s1328_s25 }
   0xf   : > { %1151 = vmatprep.subr.bf16.mxu1 %v1237_v1  ;;  %1157 = vmatprep.mubr.msk.bf16.mxu1 %vm1238_vm0, %v1237_v1  ;;  %v1199_v9 = vld [vmem:[%s408_s30] sm:$0xff]   ;;  %v1203_v13 = vld [vmem:[%s1468_s7 + $0x38] sm:$0xff]   ;;  %v1206_v16 = vld [vmem:[%s1468_s7 + $0x30] sm:$0xff]   ;;  %s1095_s30 = sshll.u32 %s1473_s14, 4 }
  0x10   : > { %v1200_v11 = vld [vmem:[%s403_s15] sm:$0xff]   ;;  %v1207_v17 = vld [vmem:[%s1468_s7 + $0x68] sm:$0xff]   ;;  %v1213_v23 = vld [vmem:[%s1468_s7 + $0x58] sm:$0xff]   ;;  %s418_s21 = scalar_lea.vmem %s1464_s3, %s1095_s30  ;;  %s424_s30 = scalar_lea.vmem %s1471_s10, %s1473_s14 }
  0x11   : > { %1140 = vmatpush3.bf16.msra.mxu0 %v1193_v3  ;;  %v1208_v18 = vld [vmem:[%s1467_s6 + $0x28] sm:$0xff]   ;;  %v1210_v20 = vld [vmem:[%s1468_s7 + $0x60] sm:$0xff]   ;;  %v1214_v24 = vld [vmem:[%s1467_s6 + $0x18] sm:$0xff]  }
  0x12   : > { %1152 = vmatpush3.bf16.msra.mxu1 %v1194_v4  ;;  %1141 = vmatprep.subr.bf16.mxu0 %v1237_v1  ;;  %v1209_v19 = vld [vmem:[%s1468_s7 + $0x28] sm:$0xff]   ;;  %v1211_v21 = vld [vmem:[%s1467_s6 + $0x20] sm:$0xff]   ;;  %v1215_v25 = vld [vmem:[%s1468_s7 + $0x18] sm:$0xff]  }
  0x13   : > { %1153 = vmatprep.subr.bf16.mxu1 %v1237_v1  ;;  %v1212_v22 = vld [vmem:[%s1468_s7 + $0x20] sm:$0xff]   ;;  %v1216_v26 = vld [vmem:[%s1468_s7 + $0x50] sm:$0xff]   ;;  %v1219_v30 = vld [vmem:[%s1468_s7 + $0x48] sm:$0xff]  }
  0x14   : > { %v1217_v27 = vld [vmem:[%s1467_s6 + $0x10] sm:$0xff]   ;;  %v1227_v29 = vld [vmem:[%s418_s21 + $0x4] ss:$8 sps:$4 sm:$0xff]   ;;  %v1225_v37 = vld [vmem:[%s418_s21] ss:$8 sps:$4 sm:$0xff]  }
  0x15   : > { %1142 = vmatpush3.bf16.msra.mxu0 %v1195_v5  ;;  %v1218_v28 = vld [vmem:[%s1468_s7 + $0x10] sm:$0xff]   ;;  %v1220_v31 = vld [vmem:[%s1467_s6 + $0x8] sm:$0xff]   ;;  %v1222_v33 = vld [vmem:[%s1468_s7 + $0x40] sm:$0xff]  }
  0x16   : > { %1154 = vmatpush3.bf16.msra.mxu1 %v1196_v6  ;;  %1143 = vmatprep.subr.bf16.mxu0 %v1237_v1  ;;  %v1221_v32 = vld [vmem:[%s1468_s7 + $0x8] sm:$0xff]   ;;  %v1223_v34 = vld [vmem:[%s1467_s6] sm:$0xff]  }
  0x17   : > { %1155 = vmatprep.subr.bf16.mxu1 %v1237_v1  ;;  %v1224_v35 = vld [vmem:[%s1468_s7] sm:$0xff]  }
  0x18   : > { %v1228_v36 = vld [vmem:[%s413_s29] sm:$0xff]  }
  0x19   : > { %1144 = vmatpush3.bf16.msra.mxu0 %v1197_v7  ;;  %v1089_v54 = vld [vmem:[%s1469_s8] ss:$0 sm:$0xff] }
  0x1a   : > { %1156 = vmatpush3.bf16.msra.mxu1 %v1198_v8  ;;  %1161 = vmatprep.subr.bf16.mxu0 %v1237_v1 }
  0x1b   : > { %1115 = vmatprep.subr.bf16.mxu1 %v1201_v10 }
  0x1c   : > { %1146 = vmatmul.mubr.msk.bf16.vlgmr.msra.gmra.mxu0 %vm475_vm1, %v1199_v9 }
  0x1d   : > { %1158 = vmatmul.mubr.msk.bf16.vlgmr.msra.gmra.mxu1 %vm475_vm1, %v1200_v11  ;;  %1162 = vmatpush3.bf16.msra.mxu0 %v1202_v12 }
  0x1e   : > { %1116 = vmatpush3.bf16.msra.mxu1 %v1203_v13  ;;  %1163 = vmatprep.subr.bf16.mxu0 %v1237_v1 }
  0x1f   : > { %1117 = vmatprep.subr.bf16.mxu1 %v1204_v14  ;;  %1177 = vmatprep.mubr.msk.bf16.mxu0 %vm1238_vm0, %v1237_v1 }
  0x20   : > { %880 = vmatprep.mubr.bf16.mxu1 %v1227_v29 }
  0x21   : > { %1164 = vmatpush3.bf16.msra.mxu0 %v1205_v15 }
  0x22   : > { %1118 = vmatpush3.bf16.msra.mxu1 %v1206_v16  ;;  %1165 = vmatprep.subr.bf16.mxu0 %v1237_v1 }
  0x23   : > { %1119 = vmatprep.subr.bf16.mxu1 %v1207_v17 }
  0x25   : > { %1166 = vmatpush3.bf16.msra.mxu0 %v1208_v18 }
  0x26   : > { %1120 = vmatpush3.bf16.msra.mxu1 %v1209_v19  ;;  %1167 = vmatprep.subr.bf16.mxu0 %v1237_v1 }
  0x27   : > { %1121 = vmatprep.subr.bf16.mxu1 %v1210_v20 }
  0x29   : > { %1168 = vmatpush3.bf16.msra.mxu0 %v1211_v21 }
  0x2a   : > { %1122 = vmatpush3.bf16.msra.mxu1 %v1212_v22  ;;  %1169 = vmatprep.subr.bf16.mxu0 %v1237_v1 }
  0x2b   : > { %1123 = vmatprep.subr.bf16.mxu1 %v1213_v23 }
  0x2d   : > { %1170 = vmatpush3.bf16.msra.mxu0 %v1214_v24 }
  0x2e   : > { %1124 = vmatpush3.bf16.msra.mxu1 %v1215_v25  ;;  %1171 = vmatprep.subr.bf16.mxu0 %v1237_v1 }
  0x2f   : > { %1125 = vmatprep.subr.bf16.mxu1 %v1216_v26 }
  0x31   : > { %1172 = vmatpush3.bf16.msra.mxu0 %v1217_v27 }
  0x32   : > { %1126 = vmatpush3.bf16.msra.mxu1 %v1218_v28  ;;  %1173 = vmatprep.subr.bf16.mxu0 %v1237_v1 }
  0x33   : > { %1127 = vmatprep.subr.bf16.mxu1 %v1219_v30 }
  0x35   : > { %1174 = vmatpush3.bf16.msra.mxu0 %v1220_v31 }
  0x36   : > { %1128 = vmatpush3.bf16.msra.mxu1 %v1221_v32  ;;  %1175 = vmatprep.subr.bf16.mxu0 %v1237_v1 }
  0x37   : > { %1129 = vmatprep.subr.bf16.mxu1 %v1222_v33 }
  0x39   : > { %1176 = vmatpush3.bf16.msra.mxu0 %v1223_v34 }
  0x3a   : > { %1130 = vmatpush3.bf16.msra.mxu1 %v1224_v35 }
  0x3c   : > { %1178 = vmatmul.mubr.bf16.vlgmr.msra.gmra.mxu0 %v1228_v36 }
  0x3d   : > { %881 = vmatmul.mubr.bf16.vlgmr.msra.gmra.mxu1 %v1225_v37 }
  0xdc   : > { %v513_v38 = vpop.f32.mrf.mxu0 }
  0xdd   : > { %v586_v39 = vpop.f32.mrf.mxu1 }
  0xde   : > { %v1147_v40 = vpop.f32.mrf.mxu0  ;;  %v587_v48 = vadd.f32 %v586_v39, %v513_v38 }
  0xdf   : > { %v1159_v41 = vpop.f32.mrf.mxu1 }
  0xe0   : > { %v516_v42 = vpop.f32.mrf.mxu0 }
  0xe1   : > { %v589_v43 = vpop.f32.mrf.mxu1 }
  0xe2   : > { %v1148_v44 = vpop.f32.mrf.mxu0  ;;  %v590_v56 = vadd.f32 %v589_v43, %v516_v42 }
  0xe3   : > { %v1160_v45 = vpop.f32.mrf.mxu1 }
  0xfc   : > { %v699_v46 = vpop.f32.mrf.mxu0 }
  0xfd   : > { %v1131_v47 = vpop.f32.mrf.mxu1  ;;  %v706_v51 = vadd.f32 %v699_v46, %v587_v48 }
  0xfe   : > { %v1179_v49 = vpop.f32.mrf.mxu0 }
  0xff   : > { %v1132_v50 = vpop.f32.mrf.mxu1 }
 0x100   : > { %v1133_v52 = vadd.f32 %v1132_v50, %v1131_v47  ;;  %v702_v53 = vpop.f32.mrf.mxu0 }
 0x101   : > { %v1134_v55 = vpop.f32.mrf.mxu1  ;;  %v707_v61 = vadd.f32 %v702_v53, %v590_v56 }
 0x102   : > { %v889_v57 = vadd.f32 %v1133_v52, %v706_v51  ;;  %v1180_v58 = vpop.f32.mrf.mxu0 }
 0x103   : > { %v1135_v59 = vpop.f32.mrf.mxu1 }
 0x104   : > { %v898_v60 = vadd.f32 %v1089_v54, %v889_v57  ;;  %v1136_v62 = vadd.f32 %v1135_v59, %v1134_v55 }
 0x106   : > { %v902_v63 = vmul.f32 0.2, %v898_v60  ;;  %v890_v0 = vadd.f32 %v1136_v62, %v707_v61  ;;  %vm900_vm2 = vcmp.ge.f32.partialorder %v898_v60, 0.0 }
 0x108   : > { %v899_v1 = vadd.f32 %v1089_v54, %v890_v0  ;;  %v904_v2 = vsel %vm900_vm2, %v898_v60, %v902_v63 }
 0x109   : > { %v906_v5 = vsel %vm475_vm1, %v904_v2, -inf  ;;  %v917_v6 = vsel %vm475_vm1, %v904_v2, 0.0 }
 0x10a   : > { %vm901_vm3 = vcmp.ge.f32.partialorder %v899_v1, 0.0  ;;  %v903_v3 = vmul.f32 0.2, %v899_v1 }
 0x10c   : > { %v905_v4 = vsel %vm901_vm3, %v899_v1, %v903_v3 }
 0x10d   : > { %v907_v7 = vsel %vm475_vm1, %v905_v4, -inf  ;;  %v918_v8 = vsel %vm475_vm1, %v905_v4, 0.0 }
 0x10e   : > { %v908_v9 = vmax.f32 %v906_v5, %v907_v7  ;;  %v919_v10 = vadd.f32 %v918_v8, %v917_v6 }
 0x110   : > { %v909_v11 = vrot.slane %v908_v9, 4  ;;  %v920_v12 = vrot.slane %v919_v10, 4 }
 0x112   : > { %v910_v13 = vmax.f32 %v908_v9, %v909_v11  ;;  %v921_v14 = vadd.f32 %v920_v12, %v919_v10 }
 0x114   : > { %v911_v15 = vrot.slane %v910_v13, 2  ;;  %v922_v16 = vrot.slane %v921_v14, 2 }
 0x116   : > { %v912_v17 = vmax.f32 %v910_v13, %v911_v15  ;;  %v923_v18 = vadd.f32 %v922_v16, %v921_v14 }
 0x118   : > { %v913_v19 = vrot.slane %v912_v17, 1  ;;  %v924_v20 = vrot.slane %v923_v18, 1 }
 0x11a   : > { %v914_v21 = vmax.f32 %v912_v17, %v913_v19  ;;  %v925_v22 = vadd.f32 %v924_v20, %v923_v18 }
 0x11c   : > { %916 = vst.msk [vmem:[%s421_s28] sm:$0x1] %vm915_vm4, %v914_v21  ;;  %v927_v23 = vmul.f32 0.0625, %v925_v22 }
 0x11e   : > { %928 = vst.msk [vmem:[%s424_s30] sm:$0x1] %vm915_vm4, %v927_v23 }
 0x11f PF: > { %s21_s13 = sadd.s32 1, %s1235_s13  }
 0x120   : > { %p18_p4 = scmp.ge.s32.totalorder %s21_s13, 4  }
 0x122   :  { %20 = sbr.rel (!%p18_p4) target bundleno = 1 (0x1), region = 107 }

// kernel: dgcnn_forward.11
= control target key start
LH: loop header
LB: loop body
LE: loop exit
PB: predicated region body
PF: predicated region fallthrough
CT: control target
= control target key end

     0   :  { %v1303_v1 = vmov 0   ;;  %s1709_s1 = inlined_call_operand.vmem [shape: bf16[128,512], index: 1, kind: input, shape index: {}]   ;;  %s1710_s3 = inlined_call_operand.vmem [shape: bf16[512,256], index: 3, kind: input, shape index: {}]   ;;  %s1711_s0 = inlined_call_operand.vmem [shape: f32[8,128], index: 0, kind: input, shape index: {}]   ;;  %s1712_s5 = inlined_call_operand.vmem [shape: bf16[256,128], index: 5, kind: input, shape index: {}]   ;;  %s1713_s2 = inlined_call_operand.vmem [shape: f32[1,512], index: 2, kind: input, shape index: {}]   ;;  %s1714_s4 = inlined_call_operand.vmem [shape: f32[1,256], index: 4, kind: input, shape index: {}]   ;;  %s1715_s6 = inlined_call_operand.vmem [shape: f32[1,128], index: 6, kind: input, shape index: {}]   ;;  %s1716_s7 = inlined_call_operand.vmem [shape: f32[8,128], index: 7, kind: output, shape index: {}]  }
   0x1   :  { %v1143_v0 = vld [vmem:[%s1709_s1 + $0xe4] ss:$16 sps:$4 sm:$0xff]   ;;  %275 = vmatprep.mubr.bf16.mxu0 %v1303_v1  ;;  %316 = vmatprep.mubr.bf16.mxu1 %v1303_v1  ;;  %v1145_v2 = vld [vmem:[%s1709_s1 + $0xec] ss:$16 sps:$4 sm:$0xff]   ;;  %v1147_v3 = vld [vmem:[%s1709_s1 + $0xe0] ss:$16 sps:$4 sm:$0xff]  }
   0x2   :  { %243 = vmatprep.subr.bf16.mxu0 %v1143_v0  ;;  %v1148_v4 = vld [vmem:[%s1709_s1 + $0xe8] ss:$16 sps:$4 sm:$0xff]   ;;  %284 = vmatprep.subr.bf16.mxu1 %v1145_v2  ;;  %v1149_v5 = vld [vmem:[%s1709_s1 + $0xc4] ss:$16 sps:$4 sm:$0xff]   ;;  %v1151_v6 = vld [vmem:[%s1709_s1 + $0xcc] ss:$16 sps:$4 sm:$0xff]  }
   0x3   :  { %244 = vmatpush1.bf16.msra.mxu0 %v1147_v3  ;;  %285 = vmatpush1.bf16.msra.mxu1 %v1148_v4  ;;  %v1153_v7 = vld [vmem:[%s1709_s1 + $0xc0] ss:$16 sps:$4 sm:$0xff]   ;;  %v1154_v8 = vld [vmem:[%s1709_s1 + $0xc8] ss:$16 sps:$4 sm:$0xff]   ;;  %v1155_v9 = vld [vmem:[%s1709_s1 + $0xa4] ss:$16 sps:$4 sm:$0xff]  }
   0x4   :  { %245 = vmatprep.subr.bf16.mxu0 %v1149_v5  ;;  %286 = vmatprep.subr.bf16.mxu1 %v1151_v6  ;;  %v1157_v10 = vld [vmem:[%s1709_s1 + $0xac] ss:$16 sps:$4 sm:$0xff]   ;;  %v1159_v11 = vld [vmem:[%s1709_s1 + $0xa0] ss:$16 sps:$4 sm:$0xff]   ;;  %v1160_v12 = vld [vmem:[%s1709_s1 + $0xa8] ss:$16 sps:$4 sm:$0xff]  }
   0x5   :  { %v1161_v13 = vld [vmem:[%s1709_s1 + $0x84] ss:$16 sps:$4 sm:$0xff]   ;;  %v1163_v14 = vld [vmem:[%s1709_s1 + $0x8c] ss:$16 sps:$4 sm:$0xff]   ;;  %v1165_v15 = vld [vmem:[%s1709_s1 + $0x80] ss:$16 sps:$4 sm:$0xff]  }
   0x6   :  { %v1166_v16 = vld [vmem:[%s1709_s1 + $0x88] ss:$16 sps:$4 sm:$0xff]   ;;  %v1167_v17 = vld [vmem:[%s1709_s1 + $0x64] ss:$16 sps:$4 sm:$0xff]   ;;  %v1169_v18 = vld [vmem:[%s1709_s1 + $0x6c] ss:$16 sps:$4 sm:$0xff]  }
   0x7   :  { %246 = vmatpush1.bf16.msra.mxu0 %v1153_v7  ;;  %287 = vmatpush1.bf16.msra.mxu1 %v1154_v8  ;;  %v1171_v19 = vld [vmem:[%s1709_s1 + $0x60] ss:$16 sps:$4 sm:$0xff]   ;;  %v1172_v20 = vld [vmem:[%s1709_s1 + $0x68] ss:$16 sps:$4 sm:$0xff]   ;;  %v1173_v21 = vld [vmem:[%s1709_s1 + $0x44] ss:$16 sps:$4 sm:$0xff]  }
   0x8   :  { %247 = vmatprep.subr.bf16.mxu0 %v1155_v9  ;;  %288 = vmatprep.subr.bf16.mxu1 %v1157_v10  ;;  %v1175_v22 = vld [vmem:[%s1709_s1 + $0x4c] ss:$16 sps:$4 sm:$0xff]   ;;  %v1177_v23 = vld [vmem:[%s1709_s1 + $0x40] ss:$16 sps:$4 sm:$0xff]   ;;  %v1178_v24 = vld [vmem:[%s1709_s1 + $0x48] ss:$16 sps:$4 sm:$0xff]  }
   0x9   :  { %v1179_v25 = vld [vmem:[%s1709_s1 + $0x24] ss:$16 sps:$4 sm:$0xff]   ;;  %v1181_v26 = vld [vmem:[%s1709_s1 + $0x2c] ss:$16 sps:$4 sm:$0xff]   ;;  %v1183_v27 = vld [vmem:[%s1709_s1 + $0x20] ss:$16 sps:$4 sm:$0xff]  }
   0xa   :  { %v1184_v28 = vld [vmem:[%s1709_s1 + $0x28] ss:$16 sps:$4 sm:$0xff]   ;;  %v1185_v29 = vld [vmem:[%s1709_s1 + $0x4] ss:$16 sps:$4 sm:$0xff]   ;;  %v1187_v30 = vld [vmem:[%s1709_s1 + $0xc] ss:$16 sps:$4 sm:$0xff]  }
   0xb   :  { %248 = vmatpush1.bf16.msra.mxu0 %v1159_v11  ;;  %289 = vmatpush1.bf16.msra.mxu1 %v1160_v12  ;;  %v1189_v31 = vld [vmem:[%s1709_s1] ss:$16 sps:$4 sm:$0xff]   ;;  %v1190_v32 = vld [vmem:[%s1709_s1 + $0x8] ss:$16 sps:$4 sm:$0xff]   ;;  %v1193_v34 = vld [vmem:[%s1710_s3 + $0x74] ss:$8 sps:$4 sm:$0xff]  }
   0xc   :  { %249 = vmatprep.subr.bf16.mxu0 %v1161_v13  ;;  %290 = vmatprep.subr.bf16.mxu1 %v1163_v14  ;;  %v27_v33 = vld [vmem:[%s1711_s0] sm:$0xff]  ;;  %v1196_v35 = vld [vmem:[%s1710_s3 + $0x174] ss:$8 sps:$4 sm:$0xff]   ;;  %v1191_v37 = vld [vmem:[%s1710_s3 + $0x70] ss:$8 sps:$4 sm:$0xff]  }
   0xd   :  { %v28_v36 = vpack.c.bf16 %v27_v33, %v27_v33  ;;  %v1194_v38 = vld [vmem:[%s1710_s3 + $0x170] ss:$8 sps:$4 sm:$0xff]   ;;  %v1199_v39 = vld [vmem:[%s1710_s3 + $0x64] ss:$8 sps:$4 sm:$0xff]   ;;  %v1197_v41 = vld [vmem:[%s1710_s3 + $0x60] ss:$8 sps:$4 sm:$0xff]  }
   0xe   :  { %v1202_v40 = vld [vmem:[%s1710_s3 + $0x164] ss:$8 sps:$4 sm:$0xff]   ;;  %v1200_v42 = vld [vmem:[%s1710_s3 + $0x160] ss:$8 sps:$4 sm:$0xff]   ;;  %v1205_v43 = vld [vmem:[%s1710_s3 + $0x54] ss:$8 sps:$4 sm:$0xff]  }
   0xf   :  { %250 = vmatpush1.bf16.msra.mxu0 %v1165_v15  ;;  %291 = vmatpush1.bf16.msra.mxu1 %v1166_v16  ;;  %v1208_v44 = vld [vmem:[%s1710_s3 + $0x154] ss:$8 sps:$4 sm:$0xff]   ;;  %v1203_v45 = vld [vmem:[%s1710_s3 + $0x50] ss:$8 sps:$4 sm:$0xff]   ;;  %v1211_v47 = vld [vmem:[%s1710_s3 + $0x44] ss:$8 sps:$4 sm:$0xff]  }
  0x10   :  { %251 = vmatprep.subr.bf16.mxu0 %v1167_v17  ;;  %292 = vmatprep.subr.bf16.mxu1 %v1169_v18  ;;  %v1206_v46 = vld [vmem:[%s1710_s3 + $0x150] ss:$8 sps:$4 sm:$0xff]   ;;  %v1214_v48 = vld [vmem:[%s1710_s3 + $0x144] ss:$8 sps:$4 sm:$0xff]   ;;  %v1209_v49 = vld [vmem:[%s1710_s3 + $0x40] ss:$8 sps:$4 sm:$0xff]  }
  0x11   :  { %v1212_v50 = vld [vmem:[%s1710_s3 + $0x140] ss:$8 sps:$4 sm:$0xff]   ;;  %v1217_v51 = vld [vmem:[%s1710_s3 + $0x34] ss:$8 sps:$4 sm:$0xff]   ;;  %v1215_v53 = vld [vmem:[%s1710_s3 + $0x30] ss:$8 sps:$4 sm:$0xff]  }
  0x12   :  { %v1220_v52 = vld [vmem:[%s1710_s3 + $0x134] ss:$8 sps:$4 sm:$0xff]   ;;  %v1218_v54 = vld [vmem:[%s1710_s3 + $0x130] ss:$8 sps:$4 sm:$0xff]   ;;  %v1223_v55 = vld [vmem:[%s1710_s3 + $0x24] ss:$8 sps:$4 sm:$0xff]  }
  0x13   :  { %252 = vmatpush1.bf16.msra.mxu0 %v1171_v19  ;;  %293 = vmatpush1.bf16.msra.mxu1 %v1172_v20  ;;  %v1226_v56 = vld [vmem:[%s1710_s3 + $0x124] ss:$8 sps:$4 sm:$0xff]   ;;  %v1221_v57 = vld [vmem:[%s1710_s3 + $0x20] ss:$8 sps:$4 sm:$0xff]   ;;  %v1229_v59 = vld [vmem:[%s1710_s3 + $0x14] ss:$8 sps:$4 sm:$0xff]  }
  0x14   :  { %253 = vmatprep.subr.bf16.mxu0 %v1173_v21  ;;  %294 = vmatprep.subr.bf16.mxu1 %v1175_v22  ;;  %v1224_v58 = vld [vmem:[%s1710_s3 + $0x120] ss:$8 sps:$4 sm:$0xff]   ;;  %v1232_v60 = vld [vmem:[%s1710_s3 + $0x114] ss:$8 sps:$4 sm:$0xff]   ;;  %v1227_v61 = vld [vmem:[%s1710_s3 + $0x10] ss:$8 sps:$4 sm:$0xff]  }
  0x15   :  { %v1230_v62 = vld [vmem:[%s1710_s3 + $0x110] ss:$8 sps:$4 sm:$0xff]   ;;  %v1235_v63 = vld [vmem:[%s1710_s3 + $0x4] ss:$8 sps:$4 sm:$0xff]   ;;  %v1233_v1 = vld [vmem:[%s1710_s3] ss:$8 sps:$4 sm:$0xff]  }
  0x16   :  { %v1238_v0 = vld [vmem:[%s1710_s3 + $0x104] ss:$8 sps:$4 sm:$0xff]   ;;  %v1236_v2 = vld [vmem:[%s1710_s3 + $0x100] ss:$8 sps:$4 sm:$0xff]   ;;  %v1241_v3 = vld [vmem:[%s1710_s3 + $0xf4] ss:$8 sps:$4 sm:$0xff]  }
  0x17   :  { %254 = vmatpush1.bf16.msra.mxu0 %v1177_v23  ;;  %295 = vmatpush1.bf16.msra.mxu1 %v1178_v24  ;;  %v1244_v4 = vld [vmem:[%s1710_s3 + $0x1f4] ss:$8 sps:$4 sm:$0xff]   ;;  %v1239_v5 = vld [vmem:[%s1710_s3 + $0xf0] ss:$8 sps:$4 sm:$0xff]   ;;  %v1247_v7 = vld [vmem:[%s1710_s3 + $0xe4] ss:$8 sps:$4 sm:$0xff]  }
  0x18   :  { %255 = vmatprep.subr.bf16.mxu0 %v1179_v25  ;;  %296 = vmatprep.subr.bf16.mxu1 %v1181_v26  ;;  %v1242_v6 = vld [vmem:[%s1710_s3 + $0x1f0] ss:$8 sps:$4 sm:$0xff]   ;;  %v1250_v8 = vld [vmem:[%s1710_s3 + $0x1e4] ss:$8 sps:$4 sm:$0xff]   ;;  %v1245_v9 = vld [vmem:[%s1710_s3 + $0xe0] ss:$8 sps:$4 sm:$0xff]  }
  0x19   :  { %v1248_v10 = vld [vmem:[%s1710_s3 + $0x1e0] ss:$8 sps:$4 sm:$0xff]   ;;  %v1253_v11 = vld [vmem:[%s1710_s3 + $0xd4] ss:$8 sps:$4 sm:$0xff]   ;;  %v1251_v13 = vld [vmem:[%s1710_s3 + $0xd0] ss:$8 sps:$4 sm:$0xff]  }
  0x1a   :  { %v1256_v12 = vld [vmem:[%s1710_s3 + $0x1d4] ss:$8 sps:$4 sm:$0xff]   ;;  %v1254_v14 = vld [vmem:[%s1710_s3 + $0x1d0] ss:$8 sps:$4 sm:$0xff]   ;;  %v1259_v15 = vld [vmem:[%s1710_s3 + $0xc4] ss:$8 sps:$4 sm:$0xff]  }
  0x1b   :  { %256 = vmatpush1.bf16.msra.mxu0 %v1183_v27  ;;  %297 = vmatpush1.bf16.msra.mxu1 %v1184_v28  ;;  %v1262_v16 = vld [vmem:[%s1710_s3 + $0x1c4] ss:$8 sps:$4 sm:$0xff]   ;;  %v1257_v17 = vld [vmem:[%s1710_s3 + $0xc0] ss:$8 sps:$4 sm:$0xff]   ;;  %v1265_v19 = vld [vmem:[%s1710_s3 + $0xb4] ss:$8 sps:$4 sm:$0xff]  }
  0x1c   :  { %257 = vmatprep.subr.bf16.mxu0 %v1185_v29  ;;  %298 = vmatprep.subr.bf16.mxu1 %v1187_v30  ;;  %v1260_v18 = vld [vmem:[%s1710_s3 + $0x1c0] ss:$8 sps:$4 sm:$0xff]   ;;  %v1268_v20 = vld [vmem:[%s1710_s3 + $0x1b4] ss:$8 sps:$4 sm:$0xff]   ;;  %v1263_v21 = vld [vmem:[%s1710_s3 + $0xb0] ss:$8 sps:$4 sm:$0xff]  }
  0x1d   :  { %v1266_v22 = vld [vmem:[%s1710_s3 + $0x1b0] ss:$8 sps:$4 sm:$0xff]   ;;  %v1271_v23 = vld [vmem:[%s1710_s3 + $0xa4] ss:$8 sps:$4 sm:$0xff]   ;;  %v1269_v25 = vld [vmem:[%s1710_s3 + $0xa0] ss:$8 sps:$4 sm:$0xff]  }
  0x1e   :  { %v1274_v24 = vld [vmem:[%s1710_s3 + $0x1a4] ss:$8 sps:$4 sm:$0xff]   ;;  %v1272_v26 = vld [vmem:[%s1710_s3 + $0x1a0] ss:$8 sps:$4 sm:$0xff]   ;;  %v1277_v27 = vld [vmem:[%s1710_s3 + $0x94] ss:$8 sps:$4 sm:$0xff]  }
  0x1f   :  { %258 = vmatpush1.bf16.msra.mxu0 %v1189_v31  ;;  %299 = vmatpush1.bf16.msra.mxu1 %v1190_v32  ;;  %v1280_v28 = vld [vmem:[%s1710_s3 + $0x194] ss:$8 sps:$4 sm:$0xff]   ;;  %v1275_v29 = vld [vmem:[%s1710_s3 + $0x90] ss:$8 sps:$4 sm:$0xff]   ;;  %v1281_v31 = vld [vmem:[%s1710_s3 + $0x80] ss:$8 sps:$4 sm:$0xff]  }
  0x20   :  { %737 = vmatprep.subr.bf16.mxu0 %v1193_v34  ;;  %778 = vmatprep.subr.bf16.mxu1 %v1196_v35  ;;  %v1278_v30 = vld [vmem:[%s1710_s3 + $0x190] ss:$8 sps:$4 sm:$0xff]   ;;  %v1283_v32 = vld [vmem:[%s1710_s3 + $0x84] ss:$8 sps:$4 sm:$0xff]   ;;  %v1284_v33 = vld [vmem:[%s1710_s3 + $0x180] ss:$8 sps:$4 sm:$0xff]  }
  0x21   :  { %v1286_v34 = vld [vmem:[%s1710_s3 + $0x184] ss:$8 sps:$4 sm:$0xff]   ;;  %v1287_v35 = vld [vmem:[%s1712_s5 + $0x78] sm:$0xff]  }
  0x22   :  { %276 = vmatmul.mubr.bf16.vlgmr.msra.gmra.mxu0 %v28_v36  ;;  %317 = vmatmul.mubr.bf16.vlgmr.msra.gmra.mxu1 %v28_v36  ;;  %v63_v36 = vlaneseq }
  0x23   :  { %738 = vmatpush1.bf16.msra.mxu0 %v1191_v37  ;;  %779 = vmatpush1.bf16.msra.mxu1 %v1194_v38 }
  0x24   :  { %739 = vmatprep.subr.bf16.mxu0 %v1199_v39  ;;  %780 = vmatprep.subr.bf16.mxu1 %v1202_v40  ;;  %v1638_v37 = vshrl.u32 %v63_v36, 7  ;;  %v61_v40 = vld [vmem:[%s1713_s2] sm:$0xf] }
  0x26   :  { %v65_v38 = vsub.s32 0, %v1638_v37  ;;  %v73_v39 = vsub.s32 2, %v1638_v37 }
  0x27   :  { %740 = vmatpush1.bf16.msra.mxu0 %v1197_v41  ;;  %781 = vmatpush1.bf16.msra.mxu1 %v1200_v42  ;;  %v69_v41 = vsub.s32 1, %v1638_v37  ;;  %v77_v42 = vsub.s32 3, %v1638_v37 }
  0x28   :  { %741 = vmatprep.subr.bf16.mxu0 %v1205_v43  ;;  %782 = vmatprep.subr.bf16.mxu1 %v1208_v44  ;;  %v66_v43 = vrot.slane %v61_v40, %v65_v38  ;;  %v74_v44 = vrot.slane %v61_v40, %v73_v39 }
  0x2b   :  { %742 = vmatpush1.bf16.msra.mxu0 %v1203_v45  ;;  %783 = vmatpush1.bf16.msra.mxu1 %v1206_v46 }
  0x2c   :  { %743 = vmatprep.subr.bf16.mxu0 %v1211_v47  ;;  %784 = vmatprep.subr.bf16.mxu1 %v1214_v48  ;;  %v70_v47 = vrot.slane %v61_v40, %v69_v41  ;;  %v78_v48 = vrot.slane %v61_v40, %v77_v42 }
  0x2f   :  { %744 = vmatpush1.bf16.msra.mxu0 %v1209_v49  ;;  %785 = vmatpush1.bf16.msra.mxu1 %v1212_v50 }
  0x30   :  { %745 = vmatprep.subr.bf16.mxu0 %v1217_v51  ;;  %786 = vmatprep.subr.bf16.mxu1 %v1220_v52 }
  0x33   :  { %746 = vmatpush1.bf16.msra.mxu0 %v1215_v53  ;;  %787 = vmatpush1.bf16.msra.mxu1 %v1218_v54 }
  0x34   :  { %747 = vmatprep.subr.bf16.mxu0 %v1223_v55  ;;  %788 = vmatprep.subr.bf16.mxu1 %v1226_v56 }
  0x37   :  { %748 = vmatpush1.bf16.msra.mxu0 %v1221_v57  ;;  %789 = vmatpush1.bf16.msra.mxu1 %v1224_v58 }
  0x38   :  { %749 = vmatprep.subr.bf16.mxu0 %v1229_v59  ;;  %790 = vmatprep.subr.bf16.mxu1 %v1232_v60 }
  0x3b   :  { %750 = vmatpush1.bf16.msra.mxu0 %v1227_v61  ;;  %791 = vmatpush1.bf16.msra.mxu1 %v1230_v62 }
  0x3c   :  { %751 = vmatprep.subr.bf16.mxu0 %v1235_v63  ;;  %792 = vmatprep.subr.bf16.mxu1 %v1238_v0 }
  0x3f   :  { %752 = vmatpush1.bf16.msra.mxu0 %v1233_v1  ;;  %793 = vmatpush1.bf16.msra.mxu1 %v1236_v2 }
  0x40   :  { %753 = vmatprep.subr.bf16.mxu0 %v1241_v3  ;;  %794 = vmatprep.subr.bf16.mxu1 %v1244_v4  ;;  %v1288_v4 = vld [vmem:[%s1712_s5 + $0x38] sm:$0xff]  }
  0x43   :  { %754 = vmatpush2.bf16.msra.mxu0 %v1239_v5  ;;  %795 = vmatpush2.bf16.msra.mxu1 %v1242_v6 }
  0x44   :  { %755 = vmatprep.subr.bf16.mxu0 %v1247_v7  ;;  %796 = vmatprep.subr.bf16.mxu1 %v1250_v8  ;;  %v1289_v7 = vld [vmem:[%s1712_s5 + $0x70] sm:$0xff]  }
  0x47   :  { %756 = vmatpush2.bf16.msra.mxu0 %v1245_v9  ;;  %797 = vmatpush2.bf16.msra.mxu1 %v1248_v10  ;;  %v1290_v9 = vld [vmem:[%s1712_s5 + $0x30] sm:$0xff]   ;;  %v1291_v10 = vld [vmem:[%s1712_s5 + $0x68] sm:$0xff]  }
  0x48   :  { %757 = vmatprep.subr.bf16.mxu0 %v1253_v11  ;;  %798 = vmatprep.subr.bf16.mxu1 %v1256_v12  ;;  %v1292_v11 = vld [vmem:[%s1712_s5 + $0x28] sm:$0xff]   ;;  %v1293_v12 = vld [vmem:[%s1712_s5 + $0x60] sm:$0xff]  }
  0x4b   :  { %758 = vmatpush2.bf16.msra.mxu0 %v1251_v13  ;;  %799 = vmatpush2.bf16.msra.mxu1 %v1254_v14  ;;  %v1294_v13 = vld [vmem:[%s1712_s5 + $0x20] sm:$0xff]   ;;  %v1295_v14 = vld [vmem:[%s1712_s5 + $0x58] sm:$0xff]  }
  0x4c   :  { %759 = vmatprep.subr.bf16.mxu0 %v1259_v15  ;;  %800 = vmatprep.subr.bf16.mxu1 %v1262_v16  ;;  %v1296_v15 = vld [vmem:[%s1712_s5 + $0x18] sm:$0xff]   ;;  %v1297_v16 = vld [vmem:[%s1712_s5 + $0x50] sm:$0xff]  }
  0x4f   :  { %760 = vmatpush2.bf16.msra.mxu0 %v1257_v17  ;;  %801 = vmatpush2.bf16.msra.mxu1 %v1260_v18  ;;  %v1298_v17 = vld [vmem:[%s1712_s5 + $0x10] sm:$0xff]   ;;  %v1299_v18 = vld [vmem:[%s1712_s5 + $0x48] sm:$0xff]  }
  0x50   :  { %761 = vmatprep.subr.bf16.mxu0 %v1265_v19  ;;  %802 = vmatprep.subr.bf16.mxu1 %v1268_v20  ;;  %v1300_v19 = vld [vmem:[%s1712_s5 + $0x8] sm:$0xff]   ;;  %v1301_v20 = vld [vmem:[%s1712_s5 + $0x40] sm:$0xff]  }
  0x53   :  { %762 = vmatpush2.bf16.msra.mxu0 %v1263_v21  ;;  %803 = vmatpush2.bf16.msra.mxu1 %v1266_v22  ;;  %v1302_v21 = vld [vmem:[%s1712_s5] sm:$0xff]  }
  0x54   :  { %763 = vmatprep.subr.bf16.mxu0 %v1271_v23  ;;  %804 = vmatprep.subr.bf16.mxu1 %v1274_v24  ;;  %v405_v22 = vld [vmem:[%s1714_s4] sm:$0x3] }
  0x55   :  { %v410_v23 = vrot.slane %v405_v22, %v65_v38  ;;  %v414_v24 = vrot.slane %v405_v22, %v69_v41 }
  0x57   :  { %764 = vmatpush2.bf16.msra.mxu0 %v1269_v25  ;;  %805 = vmatpush2.bf16.msra.mxu1 %v1272_v26 }
  0x58   :  { %765 = vmatprep.subr.bf16.mxu0 %v1277_v27  ;;  %806 = vmatprep.subr.bf16.mxu1 %v1280_v28 }
  0x5b   :  { %766 = vmatpush2.bf16.msra.mxu0 %v1275_v29  ;;  %807 = vmatpush2.bf16.msra.mxu1 %v1278_v30 }
  0x5c   :  { %767 = vmatprep.subr.bf16.mxu0 %v1283_v32  ;;  %808 = vmatprep.subr.bf16.mxu1 %v1286_v34 }
  0x5f   :  { %768 = vmatpush2.bf16.msra.mxu0 %v1281_v31  ;;  %809 = vmatpush2.bf16.msra.mxu1 %v1284_v33 }
  0x60   :  { %1120 = vmatprep.subr.bf16.mxu0 %v1287_v35 }
  0xe2   :  { %v277_v45 = vpop.f32.mrf.mxu0  ;;  %v318_v46 = vpop.f32.mrf.mxu1 }
  0xe3   :  { %v278_v49 = vadd.f32 %v277_v45, %v66_v43  ;;  %v319_v50 = vadd.f32 %v318_v46, %v74_v44  ;;  %v1103_v44 = vld [vmem:[%s1715_s6] ss:$0 sm:$0xff] }
  0xe4   :  { %v279_v51 = vpop.f32.mrf.mxu0  ;;  %v320_v52 = vpop.f32.mrf.mxu1 }
  0xe5   :  { %v329_v53 = vmul.f32 0.2, %v278_v49  ;;  %vm325_vm0 = vcmp.ge.f32.partialorder %v278_v49, 0.0  ;;  %v331_v54 = vmul.f32 0.2, %v319_v50  ;;  %v280_v55 = vadd.f32 %v279_v51, %v70_v47 }
  0xe6   :  { %v321_v56 = vadd.f32 %v320_v52, %v78_v48  ;;  %v281_v57 = vpop.f32.mrf.mxu0  ;;  %v322_v58 = vpop.f32.mrf.mxu1  ;;  %vm327_vm1 = vcmp.ge.f32.partialorder %v319_v50, 0.0 }
  0xe7   :  { %vm326_vm2 = vcmp.ge.f32.partialorder %v280_v55, 0.0  ;;  %v330_v59 = vmul.f32 0.2, %v280_v55  ;;  %v333_v62 = vsel %vm325_vm0, %v278_v49, %v329_v53  ;;  %v335_v0 = vsel %vm327_vm1, %v319_v50, %v331_v54 }
  0xe8   :  { %v282_v60 = vpop.f32.mrf.mxu0  ;;  %v323_v61 = vpop.f32.mrf.mxu1  ;;  %vm328_vm3 = vcmp.ge.f32.partialorder %v321_v56, 0.0  ;;  %v332_v63 = vmul.f32 0.2, %v321_v56  ;;  %v337_v5 = vpack.c.bf16 %v333_v62, %v333_v62  ;;  %v339_v8 = vpack.c.bf16 %v335_v0, %v335_v0 }
  0xe9   :  { %v334_v1 = vsel %vm326_vm2, %v280_v55, %v330_v59 }
  0xea   :  { %v338_v2 = vpack.c.bf16 %v334_v1, %v334_v1  ;;  %v336_v3 = vsel %vm328_vm3, %v321_v56, %v332_v63 }
  0xeb   :  { %v340_v6 = vpack.c.bf16 %v336_v3, %v336_v3 }
  0xec   :  { %769 = vmatprep.mubr.bf16.mxu0 %v338_v2 }
  0xed   :  { %810 = vmatprep.mubr.bf16.mxu1 %v340_v6  ;;  %770 = vmatmul.mubr.bf16.vlgmr.msra.gmra.mxu0 %v337_v5 }
  0xee   :  { %811 = vmatmul.mubr.bf16.vlgmr.msra.gmra.mxu1 %v339_v8  ;;  %1121 = vmatpush3.bf16.msra.mxu0 %v1288_v4 }
  0xef   :  { %1122 = vmatprep.subr.bf16.mxu0 %v1289_v7 }
  0xf2   :  { %1123 = vmatpush3.bf16.msra.mxu0 %v1290_v9 }
  0xf3   :  { %1124 = vmatprep.subr.bf16.mxu0 %v1291_v10 }
  0xf6   :  { %1125 = vmatpush3.bf16.msra.mxu0 %v1292_v11 }
  0xf7   :  { %1126 = vmatprep.subr.bf16.mxu0 %v1293_v12 }
  0xfa   :  { %1127 = vmatpush3.bf16.msra.mxu0 %v1294_v13 }
  0xfb   :  { %1128 = vmatprep.subr.bf16.mxu0 %v1295_v14 }
  0xfe   :  { %1129 = vmatpush3.bf16.msra.mxu0 %v1296_v15 }
  0xff   :  { %1130 = vmatprep.subr.bf16.mxu0 %v1297_v16 }
 0x102   :  { %1131 = vmatpush3.bf16.msra.mxu0 %v1298_v17 }
 0x103   :  { %1132 = vmatprep.subr.bf16.mxu0 %v1299_v18 }
 0x106   :  { %1133 = vmatpush3.bf16.msra.mxu0 %v1300_v19 }
 0x107   :  { %1134 = vmatprep.subr.bf16.mxu0 %v1301_v20 }
 0x10a   :  { %1135 = vmatpush3.bf16.msra.mxu0 %v1302_v21 }
 0x1ad   :  { %v771_v25 = vpop.f32.mrf.mxu0 }
 0x1ae   :  { %v772_v26 = vadd.f32 %v771_v25, %v410_v23  ;;  %v812_v27 = vpop.f32.mrf.mxu1 }
 0x1af   :  { %v773_v28 = vpop.f32.mrf.mxu0 }
 0x1b0   :  { %v813_v29 = vadd.f32 %v812_v27, %v772_v26  ;;  %v774_v30 = vadd.f32 %v773_v28, %v414_v24  ;;  %v814_v31 = vpop.f32.mrf.mxu1 }
 0x1b1   :  { %v775_v32 = vpop.f32.mrf.mxu0 }
 0x1b2   :  { %vm819_vm4 = vcmp.ge.f32.partialorder %v813_v29, 0.0  ;;  %v821_v33 = vmul.f32 0.2, %v813_v29  ;;  %v815_v34 = vadd.f32 %v814_v31, %v774_v30  ;;  %v816_v35 = vpop.f32.mrf.mxu1 }
 0x1b3   :  { %v776_v36 = vpop.f32.mrf.mxu0 }
 0x1b4   :  { %vm820_vm5 = vcmp.ge.f32.partialorder %v815_v34, 0.0  ;;  %v822_v39 = vmul.f32 0.2, %v815_v34  ;;  %v817_v40 = vpop.f32.mrf.mxu1  ;;  %v823_v38 = vsel %vm819_vm4, %v813_v29, %v821_v33 }
 0x1b5   :  { %v825_v41 = vpack.c.bf16 %v823_v38, %v823_v38 }
 0x1b6   :  { %v824_v42 = vsel %vm820_vm5, %v815_v34, %v822_v39 }
 0x1b7   :  { %v826_v37 = vpack.c.bf16 %v824_v42, %v824_v42 }
 0x1b9   :  { %994 = vmatprep.mubr.bf16.mxu0 %v826_v37 }
 0x1ba   :  { %995 = vmatmul.mubr.bf16.vlgmr.msra.gmra.mxu0 %v825_v41 }
 0x27a   :  { %v1136_v43 = vpop.f32.mrf.mxu0 }
 0x27c   :  { %v1137_v45 = vpop.f32.mrf.mxu0 }
 0x27d   :  { %v1138_v46 = vadd.f32 %v1137_v45, %v1136_v43 }
 0x27e   :  { %v1139_v47 = vpop.f32.mrf.mxu0 }
 0x27f   :  { %v997_v48 = vadd.f32 %v1138_v46, %v1103_v44 }
 0x280   :  { %v1140_v49 = vpop.f32.mrf.mxu0 }
 0x281   :  { %1002 = vst [vmem:[%s1716_s7] sm:$0xff] %v997_v48 }

</bundles_post_ra>
